<compile_context>
chip_gen: v6e
topology: v6e:2x2x1
jax: 0.10.0
libtpu: 0.0.40
codegen_flags: <defaults>
</compile_context>

<pallas_src>
import jax
import jax.numpy as jnp
from jax.experimental import pallas as pl
from jax.experimental.pallas import tpu as pltpu


# ----------------------------------------------------------------------------
# Fused kernel: one batch sample per grid step.
#   xp_ref : (1, H+2, W+2, C_in)  mean-padded raw input (NHWC), VMEM
#   w_ref  : (9, C_in, C_out)     normalization-folded per-tap conv weights
#   b_ref  : (1, C_out)           normalization-folded bias
#   o_ref  : (1, 1, C_out)        softmax(global_avg_pool(relu(conv(x))))
# ----------------------------------------------------------------------------
def _fused_forward_kernel(xp_ref, w_ref, b_ref, o_ref):
    _, hp, wp, c_in = xp_ref.shape
    h, w = hp - 2, wp - 2
    c_out = o_ref.shape[-1]

    xp = xp_ref[...]  # whole padded sample stays resident in VMEM

    # Conv 3x3 (pad=1, stride=1) as 9 shifted-tap matmuls, accumulated in f32.
    acc = jnp.zeros((h * w, c_out), jnp.float32)
    for t in range(9):  # statically unrolled
        i, j = t // 3, t % 3
        xs = xp[0, i:i + h, j:j + w, :].reshape(h * w, c_in)   # (H*W, C_in)
        acc = acc + jnp.dot(xs, w_ref[t], preferred_element_type=jnp.float32)

    # Bias + ReLU (normalization already folded into w/b).
    y = jnp.maximum(acc + b_ref[...], 0.0)                     # (H*W, C_out)

    # Global average pool over spatial positions.
    pooled = jnp.mean(y, axis=0, keepdims=True)                # (1, C_out)

    # Softmax over channels (max-subtracted); reciprocal goes to the EUP slot.
    m = pooled - jnp.max(pooled, axis=-1, keepdims=True)
    e = jnp.exp(m)
    denom = jnp.sum(e, axis=-1, keepdims=True)
    probs = e * pl.reciprocal(denom, approx=False)
    o_ref[...] = probs.reshape(1, 1, c_out)


# ----------------------------------------------------------------------------
# ModelWrapper equivalent: preprocess -> model -> postprocess, fully fused.
# ----------------------------------------------------------------------------
class ModelWrapperPallas:
    def __init__(self, weight, bias, mean_c, std_c):
        # weight: (C_out, C_in, KH, KW) PyTorch OIHW layout; bias: (C_out,)
        c_out, c_in, kh, kw = weight.shape
        assert (kh, kw) == (3, 3), "this instantiation implements a 3x3 conv"
        inv_std = 1.0 / std_c

        # Fold normalization into the conv parameters:
        #   conv(pad0((x - mean)/std), W) + b
        #     == conv(pad_mean(x), W/std) + (b - sum_{c,kh,kw} W*mean/std)
        w_fold = weight * inv_std[None, :, None, None]
        b_fold = bias - jnp.sum(
            weight * (mean_c * inv_std)[None, :, None, None], axis=(1, 2, 3)
        )

        # Per-tap weights, tap-major: (KH*KW, C_in, C_out); tap t = i*KW + j.
        self.w_taps = jnp.transpose(w_fold, (2, 3, 1, 0)).reshape(kh * kw, c_in, c_out)
        self.b_fold = b_fold.reshape(1, c_out)
        self.mean_c = mean_c
        self.c_in, self.c_out, self.kh, self.kw = c_in, c_out, kh, kw

        self._forward = jax.jit(self._forward_impl)

    def _forward_impl(self, x_nchw):
        n, c_in, h, w = x_nchw.shape
        c_out = self.c_out

        # Layout plumbing only (no compute): NCHW -> NHWC, pad H/W by 1 with the
        # per-channel mean (mean normalizes to exactly zero, preserving the
        # original "pad after normalization" semantics at the borders).
        x_nhwc = jnp.transpose(x_nchw, (0, 2, 3, 1))
        xp = jnp.broadcast_to(
            self.mean_c.astype(x_nchw.dtype), (n, h + 2, w + 2, c_in)
        )
        xp = jax.lax.dynamic_update_slice(xp, x_nhwc, (0, 1, 1, 0))

        # NOTE: at production H/W, tile the H*W rows (512-2048 per block) with a
        # resident pooled accumulator and size blocks for v7x's 64 MiB VMEM.
        # At this toy size one sample per grid step fits trivially in VMEM.
        out = pl.pallas_call(
            _fused_forward_kernel,
            out_shape=jax.ShapeDtypeStruct((n, 1, c_out), jnp.float32),
            grid=(n,),
            in_specs=[
                pl.BlockSpec((1, h + 2, w + 2, c_in), lambda b: (b, 0, 0, 0)),
                pl.BlockSpec((self.kh * self.kw, c_in, c_out), lambda b: (0, 0, 0)),
                pl.BlockSpec((1, c_out), lambda b: (0, 0)),
            ],
            out_specs=pl.BlockSpec((1, 1, c_out), lambda b: (b, 0, 0)),
            compiler_params=pltpu.CompilerParams(
                # batch samples are independent -> shard across v7x's 2 TCs
                dimension_semantics=("parallel",),
            ),
        )(xp, self.w_taps, self.b_fold)
        return out.reshape(n, c_out)

    def __call__(self, x):
        return self._forward(x)


if __name__ == "__main__":
    key = jax.random.PRNGKey(0)
    k_x, k_w, k_b = jax.random.split(key, 3)

    N, C_IN, H, W = 2, 4, 16, 16
    C_OUT, K = 8, 3

    x = jax.random.normal(k_x, (N, C_IN, H, W), dtype=jnp.float32)  # NCHW input
    weight = 0.1 * jax.random.normal(k_w, (C_OUT, C_IN, K, K), dtype=jnp.float32)
    bias = 0.05 * jax.random.normal(k_b, (C_OUT,), dtype=jnp.float32)
    mean_c = jnp.array([0.1, 0.2, 0.3, 0.4], dtype=jnp.float32)
    std_c = jnp.array([0.5, 0.6, 0.7, 0.8], dtype=jnp.float32)

    wrapper = ModelWrapperPallas(weight, bias, mean_c, std_c)
    out = jax.block_until_ready(wrapper(x))

    # Pure-JAX reference with the ORIGINAL (un-folded) semantics:
    # normalize -> conv(SAME)+bias -> ReLU -> global avg pool -> softmax.
    xn = (x - mean_c[None, :, None, None]) / std_c[None, :, None, None]
    y_ref = jax.lax.conv_general_dilated(
        xn, weight, window_strides=(1, 1), padding="SAME",
        dimension_numbers=("NCHW", "OIHW", "NCHW"),
    ) + bias[None, :, None, None]
    y_ref = jnp.maximum(y_ref, 0.0)
    ref = jax.nn.softmax(jnp.mean(y_ref, axis=(2, 3)), axis=-1)

    assert out.shape == (N, C_OUT)
    err = jnp.max(jnp.abs(out - ref))
    assert jnp.allclose(out, ref, atol=1e-5, rtol=1e-4), f"mismatch, max abs err={err}"

    print("KERNEL_OK")
</pallas_src>

<mosaic_0001>
module attributes {stable_mosaic.version = 11 : i64} {
  func.func @_fused_forward_kernel(%arg0: i32, %arg1: memref<1x18x18x4xf32, #tpu.memory_space<vmem>>, %arg2: memref<9x4x8xf32, #tpu.memory_space<vmem>>, %arg3: memref<1x8xf32, #tpu.memory_space<vmem>>, %arg4: memref<1x1x8xf32, #tpu.memory_space<vmem>>) attributes {dimension_semantics = [#tpu.dimension_semantics<parallel>], iteration_bounds = array<i64: 2>, scalar_prefetch = 0 : i64, scratch_operands = 0 : i64, tpu.core_type = #tpu.core_type<tc>, window_params = [{transform_indices = @transform_0, window_bounds = array<i64: 1, 18, 18, 4>}, {pipeline_mode = #tpu.pipeline_mode<synchronous>, transform_indices = @transform_1, window_bounds = array<i64: 9, 4, 8>}, {pipeline_mode = #tpu.pipeline_mode<synchronous>, transform_indices = @transform_2, window_bounds = array<i64: 1, 8>}, {transform_indices = @transform_3, window_bounds = array<i64: 1, 1, 8>}]} {
    %c0 = arith.constant 0 : index
    %c0_0 = arith.constant 0 : index
    %c0_1 = arith.constant 0 : index
    %c0_2 = arith.constant 0 : index
    %0 = vector.load %arg1[%c0, %c0_0, %c0_1, %c0_2] : memref<1x18x18x4xf32, #tpu.memory_space<vmem>>, vector<1x18x18x4xf32>
    %cst = arith.constant 0.000000e+00 : f32
    %1 = vector.broadcast %cst : f32 to vector<256x8xf32>
    %2 = vector.extract_strided_slice %0 {offsets = [0, 0, 0, 0], sizes = [1, 16, 16, 4], strides = [1, 1, 1, 1]} : vector<1x18x18x4xf32> to vector<1x16x16x4xf32>
    %3 = vector.shape_cast %2 : vector<1x16x16x4xf32> to vector<16x16x4xf32>
    %4 = vector.shape_cast %3 : vector<16x16x4xf32> to vector<256x4xf32>
    %c0_3 = arith.constant 0 : index
    %c0_4 = arith.constant 0 : index
    %c0_5 = arith.constant 0 : index
    %5 = vector.load %arg2[%c0_3, %c0_4, %c0_5] : memref<9x4x8xf32, #tpu.memory_space<vmem>>, vector<1x4x8xf32>
    %6 = vector.shape_cast %5 : vector<1x4x8xf32> to vector<4x8xf32>
    %cst_6 = arith.constant dense<0.000000e+00> : vector<256x8xf32>
    %7 = tpu.matmul %4, %6, %cst_6 {dimension_numbers = #tpu.dot_dimension_numbers<[1], [0], [0], [1], [0, 0, 1, 1], [], []>} : vector<256x4xf32>, vector<4x8xf32>, vector<256x8xf32> -> vector<256x8xf32>
    %8 = arith.addf %1, %7 : vector<256x8xf32>
    %9 = vector.extract_strided_slice %0 {offsets = [0, 0, 1, 0], sizes = [1, 16, 16, 4], strides = [1, 1, 1, 1]} : vector<1x18x18x4xf32> to vector<1x16x16x4xf32>
    %10 = vector.shape_cast %9 : vector<1x16x16x4xf32> to vector<16x16x4xf32>
    %11 = vector.shape_cast %10 : vector<16x16x4xf32> to vector<256x4xf32>
    %c1 = arith.constant 1 : index
    %c0_7 = arith.constant 0 : index
    %c0_8 = arith.constant 0 : index
    %12 = vector.load %arg2[%c1, %c0_7, %c0_8] : memref<9x4x8xf32, #tpu.memory_space<vmem>>, vector<1x4x8xf32>
    %13 = vector.shape_cast %12 : vector<1x4x8xf32> to vector<4x8xf32>
    %cst_9 = arith.constant dense<0.000000e+00> : vector<256x8xf32>
    %14 = tpu.matmul %11, %13, %cst_9 {dimension_numbers = #tpu.dot_dimension_numbers<[1], [0], [0], [1], [0, 0, 1, 1], [], []>} : vector<256x4xf32>, vector<4x8xf32>, vector<256x8xf32> -> vector<256x8xf32>
    %15 = arith.addf %8, %14 : vector<256x8xf32>
    %16 = vector.extract_strided_slice %0 {offsets = [0, 0, 2, 0], sizes = [1, 16, 16, 4], strides = [1, 1, 1, 1]} : vector<1x18x18x4xf32> to vector<1x16x16x4xf32>
    %17 = vector.shape_cast %16 : vector<1x16x16x4xf32> to vector<16x16x4xf32>
    %18 = vector.shape_cast %17 : vector<16x16x4xf32> to vector<256x4xf32>
    %c2 = arith.constant 2 : index
    %c0_10 = arith.constant 0 : index
    %c0_11 = arith.constant 0 : index
    %19 = vector.load %arg2[%c2, %c0_10, %c0_11] : memref<9x4x8xf32, #tpu.memory_space<vmem>>, vector<1x4x8xf32>
    %20 = vector.shape_cast %19 : vector<1x4x8xf32> to vector<4x8xf32>
    %cst_12 = arith.constant dense<0.000000e+00> : vector<256x8xf32>
    %21 = tpu.matmul %18, %20, %cst_12 {dimension_numbers = #tpu.dot_dimension_numbers<[1], [0], [0], [1], [0, 0, 1, 1], [], []>} : vector<256x4xf32>, vector<4x8xf32>, vector<256x8xf32> -> vector<256x8xf32>
    %22 = arith.addf %15, %21 : vector<256x8xf32>
    %23 = vector.extract_strided_slice %0 {offsets = [0, 1, 0, 0], sizes = [1, 16, 16, 4], strides = [1, 1, 1, 1]} : vector<1x18x18x4xf32> to vector<1x16x16x4xf32>
    %24 = vector.shape_cast %23 : vector<1x16x16x4xf32> to vector<16x16x4xf32>
    %25 = vector.shape_cast %24 : vector<16x16x4xf32> to vector<256x4xf32>
    %c3 = arith.constant 3 : index
    %c0_13 = arith.constant 0 : index
    %c0_14 = arith.constant 0 : index
    %26 = vector.load %arg2[%c3, %c0_13, %c0_14] : memref<9x4x8xf32, #tpu.memory_space<vmem>>, vector<1x4x8xf32>
    %27 = vector.shape_cast %26 : vector<1x4x8xf32> to vector<4x8xf32>
    %cst_15 = arith.constant dense<0.000000e+00> : vector<256x8xf32>
    %28 = tpu.matmul %25, %27, %cst_15 {dimension_numbers = #tpu.dot_dimension_numbers<[1], [0], [0], [1], [0, 0, 1, 1], [], []>} : vector<256x4xf32>, vector<4x8xf32>, vector<256x8xf32> -> vector<256x8xf32>
    %29 = arith.addf %22, %28 : vector<256x8xf32>
    %30 = vector.extract_strided_slice %0 {offsets = [0, 1, 1, 0], sizes = [1, 16, 16, 4], strides = [1, 1, 1, 1]} : vector<1x18x18x4xf32> to vector<1x16x16x4xf32>
    %31 = vector.shape_cast %30 : vector<1x16x16x4xf32> to vector<16x16x4xf32>
    %32 = vector.shape_cast %31 : vector<16x16x4xf32> to vector<256x4xf32>
    %c4 = arith.constant 4 : index
    %c0_16 = arith.constant 0 : index
    %c0_17 = arith.constant 0 : index
    %33 = vector.load %arg2[%c4, %c0_16, %c0_17] : memref<9x4x8xf32, #tpu.memory_space<vmem>>, vector<1x4x8xf32>
    %34 = vector.shape_cast %33 : vector<1x4x8xf32> to vector<4x8xf32>
    %cst_18 = arith.constant dense<0.000000e+00> : vector<256x8xf32>
    %35 = tpu.matmul %32, %34, %cst_18 {dimension_numbers = #tpu.dot_dimension_numbers<[1], [0], [0], [1], [0, 0, 1, 1], [], []>} : vector<256x4xf32>, vector<4x8xf32>, vector<256x8xf32> -> vector<256x8xf32>
    %36 = arith.addf %29, %35 : vector<256x8xf32>
    %37 = vector.extract_strided_slice %0 {offsets = [0, 1, 2, 0], sizes = [1, 16, 16, 4], strides = [1, 1, 1, 1]} : vector<1x18x18x4xf32> to vector<1x16x16x4xf32>
    %38 = vector.shape_cast %37 : vector<1x16x16x4xf32> to vector<16x16x4xf32>
    %39 = vector.shape_cast %38 : vector<16x16x4xf32> to vector<256x4xf32>
    %c5 = arith.constant 5 : index
    %c0_19 = arith.constant 0 : index
    %c0_20 = arith.constant 0 : index
    %40 = vector.load %arg2[%c5, %c0_19, %c0_20] : memref<9x4x8xf32, #tpu.memory_space<vmem>>, vector<1x4x8xf32>
    %41 = vector.shape_cast %40 : vector<1x4x8xf32> to vector<4x8xf32>
    %cst_21 = arith.constant dense<0.000000e+00> : vector<256x8xf32>
    %42 = tpu.matmul %39, %41, %cst_21 {dimension_numbers = #tpu.dot_dimension_numbers<[1], [0], [0], [1], [0, 0, 1, 1], [], []>} : vector<256x4xf32>, vector<4x8xf32>, vector<256x8xf32> -> vector<256x8xf32>
    %43 = arith.addf %36, %42 : vector<256x8xf32>
    %44 = vector.extract_strided_slice %0 {offsets = [0, 2, 0, 0], sizes = [1, 16, 16, 4], strides = [1, 1, 1, 1]} : vector<1x18x18x4xf32> to vector<1x16x16x4xf32>
    %45 = vector.shape_cast %44 : vector<1x16x16x4xf32> to vector<16x16x4xf32>
    %46 = vector.shape_cast %45 : vector<16x16x4xf32> to vector<256x4xf32>
    %c6 = arith.constant 6 : index
    %c0_22 = arith.constant 0 : index
    %c0_23 = arith.constant 0 : index
    %47 = vector.load %arg2[%c6, %c0_22, %c0_23] : memref<9x4x8xf32, #tpu.memory_space<vmem>>, vector<1x4x8xf32>
    %48 = vector.shape_cast %47 : vector<1x4x8xf32> to vector<4x8xf32>
    %cst_24 = arith.constant dense<0.000000e+00> : vector<256x8xf32>
    %49 = tpu.matmul %46, %48, %cst_24 {dimension_numbers = #tpu.dot_dimension_numbers<[1], [0], [0], [1], [0, 0, 1, 1], [], []>} : vector<256x4xf32>, vector<4x8xf32>, vector<256x8xf32> -> vector<256x8xf32>
    %50 = arith.addf %43, %49 : vector<256x8xf32>
    %51 = vector.extract_strided_slice %0 {offsets = [0, 2, 1, 0], sizes = [1, 16, 16, 4], strides = [1, 1, 1, 1]} : vector<1x18x18x4xf32> to vector<1x16x16x4xf32>
    %52 = vector.shape_cast %51 : vector<1x16x16x4xf32> to vector<16x16x4xf32>
    %53 = vector.shape_cast %52 : vector<16x16x4xf32> to vector<256x4xf32>
    %c7 = arith.constant 7 : index
    %c0_25 = arith.constant 0 : index
    %c0_26 = arith.constant 0 : index
    %54 = vector.load %arg2[%c7, %c0_25, %c0_26] : memref<9x4x8xf32, #tpu.memory_space<vmem>>, vector<1x4x8xf32>
    %55 = vector.shape_cast %54 : vector<1x4x8xf32> to vector<4x8xf32>
    %cst_27 = arith.constant dense<0.000000e+00> : vector<256x8xf32>
    %56 = tpu.matmul %53, %55, %cst_27 {dimension_numbers = #tpu.dot_dimension_numbers<[1], [0], [0], [1], [0, 0, 1, 1], [], []>} : vector<256x4xf32>, vector<4x8xf32>, vector<256x8xf32> -> vector<256x8xf32>
    %57 = arith.addf %50, %56 : vector<256x8xf32>
    %58 = vector.extract_strided_slice %0 {offsets = [0, 2, 2, 0], sizes = [1, 16, 16, 4], strides = [1, 1, 1, 1]} : vector<1x18x18x4xf32> to vector<1x16x16x4xf32>
    %59 = vector.shape_cast %58 : vector<1x16x16x4xf32> to vector<16x16x4xf32>
    %60 = vector.shape_cast %59 : vector<16x16x4xf32> to vector<256x4xf32>
    %c8 = arith.constant 8 : index
    %c0_28 = arith.constant 0 : index
    %c0_29 = arith.constant 0 : index
    %61 = vector.load %arg2[%c8, %c0_28, %c0_29] : memref<9x4x8xf32, #tpu.memory_space<vmem>>, vector<1x4x8xf32>
    %62 = vector.shape_cast %61 : vector<1x4x8xf32> to vector<4x8xf32>
    %cst_30 = arith.constant dense<0.000000e+00> : vector<256x8xf32>
    %63 = tpu.matmul %60, %62, %cst_30 {dimension_numbers = #tpu.dot_dimension_numbers<[1], [0], [0], [1], [0, 0, 1, 1], [], []>} : vector<256x4xf32>, vector<4x8xf32>, vector<256x8xf32> -> vector<256x8xf32>
    %64 = arith.addf %57, %63 : vector<256x8xf32>
    %c0_31 = arith.constant 0 : index
    %c0_32 = arith.constant 0 : index
    %65 = vector.load %arg3[%c0_31, %c0_32] : memref<1x8xf32, #tpu.memory_space<vmem>>, vector<1x8xf32>
    %66 = vector.broadcast %65 : vector<1x8xf32> to vector<256x8xf32>
    %67 = arith.addf %64, %66 : vector<256x8xf32>
    %cst_33 = arith.constant 0.000000e+00 : f32
    %68 = vector.broadcast %cst_33 : f32 to vector<256x8xf32>
    %69 = arith.maximumf %67, %68 : vector<256x8xf32>
    %cst_34 = arith.constant dense<0.000000e+00> : vector<8xf32>
    %70 = vector.multi_reduction <add>, %69, %cst_34 [0] : vector<256x8xf32> to vector<8xf32>
    %71 = vector.shape_cast %70 : vector<8xf32> to vector<1x8xf32>
    %cst_35 = arith.constant 2.560000e+02 : f32
    %72 = vector.broadcast %cst_35 : f32 to vector<1x8xf32>
    %73 = arith.divf %71, %72 : vector<1x8xf32>
    %cst_36 = arith.constant dense<0xFF800000> : vector<1xf32>
    %74 = vector.multi_reduction <maximumf>, %73, %cst_36 [1] : vector<1x8xf32> to vector<1xf32>
    %75 = vector.shape_cast %74 : vector<1xf32> to vector<1x1xf32>
    %76 = vector.broadcast %75 : vector<1x1xf32> to vector<1x8xf32>
    %77 = arith.subf %73, %76 : vector<1x8xf32>
    %78 = math.exp %77 : vector<1x8xf32>
    %cst_37 = arith.constant dense<0.000000e+00> : vector<1xf32>
    %79 = vector.multi_reduction <add>, %78, %cst_37 [1] : vector<1x8xf32> to vector<1xf32>
    %80 = vector.shape_cast %79 : vector<1xf32> to vector<1x1xf32>
    %81 = tpu.reciprocal %80 : vector<1x1xf32> -> vector<1x1xf32>
    %82 = vector.broadcast %81 : vector<1x1xf32> to vector<1x8xf32>
    %83 = arith.mulf %78, %82 : vector<1x8xf32>
    %84 = vector.shape_cast %83 : vector<1x8xf32> to vector<1x1x8xf32>
    %c0_38 = arith.constant 0 : index
    %c0_39 = arith.constant 0 : index
    %c0_40 = arith.constant 0 : index
    %85 = vector.load %arg4[%c0_38, %c0_39, %c0_40] : memref<1x1x8xf32, #tpu.memory_space<vmem>>, vector<1x1x8xf32>
    tpu.vector_store %arg4[%c0_38, %c0_39, %c0_40], %84 {strides = array<i32>} : memref<1x1x8xf32, #tpu.memory_space<vmem>>, vector<1x1x8xf32>,
    return
  }
  func.func @transform_0(%arg0: i32) -> (i32, i32, i32, i32) {
    %c0_i32 = arith.constant 0 : i32
    %c0_i32_0 = arith.constant 0 : i32
    %c0_i32_1 = arith.constant 0 : i32
    %c0_i32_2 = arith.constant 0 : i32
    return %arg0, %c0_i32, %c0_i32_0, %c0_i32_1 : i32, i32, i32, i32
  }
  func.func @transform_1(%arg0: i32) -> (i32, i32, i32) {
    %c0_i32 = arith.constant 0 : i32
    %c0_i32_0 = arith.constant 0 : i32
    %c0_i32_1 = arith.constant 0 : i32
    %c0_i32_2 = arith.constant 0 : i32
    return %c0_i32, %c0_i32_0, %c0_i32_1 : i32, i32, i32
  }
  func.func @transform_2(%arg0: i32) -> (i32, i32) {
    %c0_i32 = arith.constant 0 : i32
    %c0_i32_0 = arith.constant 0 : i32
    %c0_i32_1 = arith.constant 0 : i32
    return %c0_i32, %c0_i32_0 : i32, i32
  }
  func.func @transform_3(%arg0: i32) -> (i32, i32, i32) {
    %c0_i32 = arith.constant 0 : i32
    %c0_i32_0 = arith.constant 0 : i32
    %c0_i32_1 = arith.constant 0 : i32
    return %arg0, %c0_i32, %c0_i32_0 : i32, i32, i32
  }
}

</mosaic_0001>

<bundles_post_ra>
// kernel: _forward_impl.1
= control target key start
LH: loop header
LB: loop body
LE: loop exit
PB: predicated region body
PF: predicated region fallthrough
CT: control target
= control target key end

     0   :  { %8 = vsyncpa [#allocation3], 0  ;;  %s6080_s0 = inlined_call_operand.vmem [shape: f32[2,18,18,4], index: 0, kind: input, shape index: {}]   ;;  %s6081_s1 = inlined_call_operand.vmem [shape: f32[9,4,8], index: 1, kind: input, shape index: {}]   ;;  %s6082_s2 = inlined_call_operand.vmem [shape: f32[1,8], index: 2, kind: input, shape index: {}]   ;;  %s6083_s3 = inlined_call_operand.hbm [shape: f32[2,1,8], index: 3, kind: output, shape index: {}]  }
   0x1   :  { %10 = vsyncpa [#allocation3 + $0x1], 0  ;;  %s4383_s12 = smov 0   ;;  %s4385_s13 = smov 0  }
   0x2   :  { %s4387_s14 = smov 0   ;;  %s4389_s15 = smov 0  }
   0x3 LB: > { %s4404_s16 = sadd.s32 4294967295, %s4360_s15   ;;  %s3193_s17 = sadd.s32 4294967294, %s4360_s15   ;;  %s4360_s15 = sphi %s4389_s15, %s6329_s15   ;;  %s4356_s14 = sphi %s4387_s14, %s6328_s14   ;;  %s4352_s13 = sphi %s4385_s13, %s6327_s13   ;;  %s4348_s12 = sphi %s4383_s12, %s6326_s12  }
   0x4   : > { %s4408_s18 = sadd.s32 1, %s4360_s15   ;;  %s91_s19 = sadd.s32 1, %s4356_s14 }
   0x5   : > { %s88_s20 = ssub.s32 %s4360_s15, %s4408_s18  ;;  %p101_p0 = scmp.ne.s32.totalorder %s4356_s14, %s4352_s13 }
   0x6   : > { %p89_p1 = scmp.eq.s32.totalorder %s88_s20, 0  ;;  %p102_p2 = scmp.eq.s32.totalorder %s4404_s16, 1 }
   0x7   : > { %p107_p3 = scmp.ne.s32.totalorder %s4352_s13, %s4348_s12  ;;  %p108_p4 = scmp.eq.s32.totalorder %s3193_s17, 1 }
   0x8   : > { %s4419_s21 = scalar_select %p89_p1, %s4356_s14, %s91_s19  }
   0x9   : > { %p4421_p5 = por %p102_p2, %p101_p0  ;;  %p4425_p6 = por %p108_p4, %p107_p3 }
   0xa   : > { %p3196_p7 = scmp.ge.s32.totalorder %s4360_s15, 1  ;;  %p140_p8 = scmp.lt.s32.totalorder %s4360_s15, 3 }
   0xc   : > { %p141_p9 = pnand %p3196_p7, %p140_p8 }
   0xe   : > { %144 = sbr.rel (%p141_p9) target bundleno = 863 (0x35f), region = 32 }
  0x13   : > { %v3198_v0 = vld [vmem:[%s6081_s1 + $0x4] sm:$0xf]  ;;  %vm419_vm0 = vcmask 1043456   ;;  %p163_p10 = scmp.lt.s32.totalorder %s4404_s16, 1  ;;  %v222_v1 = vld [vmem:[%s6081_s1] sm:$0xf] }
  0x14   : > { %4254 = vmatprep.subr.msk.mxu1 %vm419_vm0, %v3198_v0  ;;  %3804 = vmatprep.subr.msk.mxu0 %vm419_vm0, %v3198_v0  ;;  %v3265_v2 = vld [vmem:[%s6081_s1 + $0x8] sm:$0xf]  ;;  %vm271_vm1 = vcmask 1046528   ;;  %vm354_vm2 = vcmask 31744   ;;  %v4494_v21 = vld [vmem:[%s6081_s1 + $0xc] sm:$0xf] }
  0x15   : > { %4255 = vmatpush3.msk.msra.mxu1 %vm419_vm0, %v3198_v0  ;;  %3805 = vmatpush3.msk.msra.mxu0 %vm419_vm0, %v3198_v0  ;;  %s164_s30 = scalar_select %p163_p10, %s4404_s16, 1  ;;  %v4512_v28 = vld [vmem:[%s6081_s1 + $0x10] sm:$0xf]  ;;  %vm940_vm3 = vcmask 1045504   ;;  %vm3040_vm4 = vcmask 64512   ;;  %vm3123_vm5 = vcmask 57344  }
  0x16   : > { %3854 = vmatprep.subr.msk.mxu1 %vm419_vm0, %v222_v1  ;;  %3904 = vmatprep.subr.msk.mxu0 %vm419_vm0, %v3265_v2  ;;  %s3504_s5 = sshll.u32 %s4404_s16, 4  ;;  %s4362_s19 = smov [#allocation2]  }
  0x17   : > { %s4256_s4 = smul.u32 432, %s164_s30  ;;  %s3136_s10 = scalar_lea.hbm %s6083_s3, %s3504_s5 }
  0x18   : > { %s4304_s20 = sshll.u32 %s4362_s19, 4  ;;  %s4305_s20 = int_to_ptr.vmem [resolvable:$false] %s4304_s20 }
  0x19   : > { %s4451_s7 = scalar_lea.vmem %s6080_s0, %s4256_s4  ;;  %s161_s4 = sand.u32 1, %s4352_s13  }
  0x1a   : > { %v4454_v3 = vld [vmem:[%s4451_s7] sm:$0xff]  ;;  %v4457_v4 = vld [vmem:[%s4451_s7 + $0x8] sm:$0xff]  ;;  %v4469_v10 = vld [vmem:[%s4451_s7 + $0x10] sm:$0x3]  ;;  %s162_s6 = scalar_lea.vmem [#allocation2], %s161_s4  ;;  %s3126_s11 = scalar_lea.sflag [#allocation3], %s161_s4 }
  0x1b   : > { %v4460_v5 = vld [vmem:[%s4451_s7 + $0xc0] sm:$0xff]  ;;  %v272_v6 = vrot.slane %v4454_v3, 1  ;;  %v273_v7 = vrot.slane %v4457_v4, 1  ;;  %v4465_v8 = vld [vmem:[%s4451_s7 + $0xc8] sm:$0xff]  ;;  %v275_v12 = vrot.slane %v4469_v10, 1  ;;  %v4477_v14 = vld [vmem:[%s4451_s7 + $0x18] sm:$0xff] }
  0x1c   : > { %v312_v9 = vrot.slane %v4460_v5, 1  ;;  %v313_v11 = vrot.slane %v4465_v8, 1  ;;  %v4474_v13 = vld [vmem:[%s4451_s7 + $0xd0] sm:$0x3]  ;;  %v4482_v17 = vld [vmem:[%s4451_s7 + $0x20] sm:$0xff]  ;;  %v277_v18 = vrot.slane %v4477_v14, 1 }
  0x1d   : > { %v274_v15 = vsel %vm271_vm1, %v272_v6, %v273_v7  ;;  %v315_v16 = vrot.slane %v4474_v13, 1  ;;  %v4486_v19 = vld [vmem:[%s4451_s7 + $0xd8] sm:$0xff]  ;;  %v4489_v20 = vld [vmem:[%s4451_s7 + $0xe0] sm:$0xff]  ;;  %v276_v23 = vsel %vm271_vm1, %v273_v7, %v275_v12  ;;  %v278_v24 = vrot.slane %v4482_v17, 1  ;;  %v4504_v26 = vld [vmem:[%s4451_s7 + $0x28] sm:$0x3] }
  0x1e   : > { %3806 = vmatprep.mubr.msk.f32.mxu0 %vm354_vm2, %v274_v15  ;;  %v4498_v22 = vsel %vm271_vm1, %v312_v9, %v313_v11  ;;  %v317_v25 = vrot.slane %v4486_v19, 1  ;;  %v4507_v27 = vld [vmem:[%s4451_s7 + $0xe8] sm:$0x3]  ;;  %v318_v30 = vrot.slane %v4489_v20, 1  ;;  %v280_v31 = vrot.slane %v4504_v26, 1  ;;  %v4524_v33 = vld [vmem:[%s4451_s7 + $0x30] sm:$0xff] }
  0x1f   : > { %6168 = vst [vmem:[#allocation5_spill] sm:$0xff] %v4498_v22  ;;  %3830 = vmatprep.mubr.msk.f32.mxu1 %vm354_vm2, %v4498_v22  ;;  %3807 = vmatmul.mubr.msk.f32.vlgmr.msra.gmra.mxu0 %vm354_vm2, %v276_v23  ;;  %v4518_v29 = vsel %vm271_vm1, %v313_v11, %v315_v16  ;;  %v320_v32 = vrot.slane %v4507_v27, 1  ;;  %v4527_v34 = vld [vmem:[%s4451_s7 + $0x38] sm:$0xff]  ;;  %v4530_v35 = vld [vmem:[%s4451_s7 + $0xf0] sm:$0xff]  ;;  %v4536_v36 = vsel %vm271_vm1, %v277_v18, %v278_v24  ;;  %v282_v37 = vrot.slane %v4524_v33, 1  ;;  %v4564_v47 = vld [vmem:[%s4451_s7 + $0x48] sm:$0xff] }
  0x20   : > { %6169 = vst [vmem:[#allocation6_spill] sm:$0xff] %v4518_v29  ;;  %3831 = vmatmul.mubr.msk.f32.vlgmr.msra.gmra.mxu1 %vm354_vm2, %v4518_v29  ;;  %3905 = vmatpush3.msk.msra.mxu0 %vm419_vm0, %v3265_v2  ;;  %6170 = vst [vmem:[#allocation7_spill] sm:$0xff] %v4536_v36  ;;  %v283_v38 = vrot.slane %v4527_v34, 1  ;;  %v4541_v39 = vld [vmem:[%s4451_s7 + $0xf8] sm:$0xff]  ;;  %v322_v40 = vrot.slane %v4530_v35, 1  ;;  %v4551_v42 = vsel %vm271_vm1, %v317_v25, %v318_v30  ;;  %v4567_v48 = vld [vmem:[%s4451_s7 + $0x50] sm:$0xff] }
  0x21   : > { %v4545_v41 = vld [vmem:[%s4451_s7 + $0x40] sm:$0x3]  ;;  %3855 = vmatpush3.msk.msra.mxu1 %vm419_vm0, %v222_v1  ;;  %3809 = vmatprep.mubr.msk.f32.mxu0 %vm354_vm2, %v4536_v36  ;;  %6171 = vst [vmem:[#allocation8_spill] sm:$0xff] %v4551_v42  ;;  %v4554_v43 = vsel %vm271_vm1, %v278_v24, %v280_v31  ;;  %v4557_v44 = vsel %vm271_vm1, %v318_v30, %v320_v32  ;;  %v323_v45 = vrot.slane %v4541_v39, 1  ;;  %v287_v52 = vrot.slane %v4564_v47, 1  ;;  %v4578_v53 = vld [vmem:[%s4451_s7 + $0x108] sm:$0xff] }
  0x22   : > { %6172 = vst [vmem:[#allocation9_spill] sm:$0xff] %v4554_v43  ;;  %6173 = vst [vmem:[#allocation10_spill] sm:$0xff] %v4557_v44  ;;  %v4561_v46 = vld [vmem:[%s4451_s7 + $0x100] sm:$0x3]  ;;  %3833 = vmatprep.mubr.msk.f32.mxu1 %vm354_vm2, %v4551_v42  ;;  %v4572_v49 = vsel %vm271_vm1, %v282_v37, %v283_v38  ;;  %v285_v50 = vrot.slane %v4545_v41, 1  ;;  %v4581_v54 = vld [vmem:[%s4451_s7 + $0x110] sm:$0xff]  ;;  %3954 = vmatprep.subr.msk.mxu1 %vm419_vm0, %v4494_v21 }
  0x23   : > { %6174 = vst [vmem:[#allocation11_spill] sm:$0xff] %v4572_v49  ;;  %v325_v51 = vrot.slane %v4561_v46, 1  ;;  %v4584_v55 = vld [vmem:[%s4451_s7 + $0x60] sm:$0xff]  ;;  %3810 = vmatmul.mubr.msk.f32.gmra.mxu0 %vm354_vm2, %v4554_v43  ;;  %v4591_v56 = vsel %vm271_vm1, %v322_v40, %v323_v45  ;;  %v288_v57 = vrot.slane %v4567_v48, 1  ;;  %v327_v58 = vrot.slane %v4578_v53, 1  ;;  %v4600_v61 = vld [vmem:[%s4451_s7 + $0x68] sm:$0xff]  ;;  %4004 = vmatprep.subr.msk.mxu0 %vm419_vm0, %v4512_v28 }
  0x24   : > { %6175 = vst [vmem:[#allocation12_spill] sm:$0xff] %v4591_v56  ;;  %v328_v59 = vrot.slane %v4581_v54, 1  ;;  %v4597_v60 = vld [vmem:[%s4451_s7 + $0x58] sm:$0x3]  ;;  %3834 = vmatmul.mubr.msk.f32.gmra.mxu1 %vm354_vm2, %v4557_v44  ;;  %3812 = vmatprep.mubr.msk.f32.mxu0 %vm354_vm2, %v4572_v49  ;;  %v4609_v62 = vsel %vm271_vm1, %v283_v38, %v285_v50  ;;  %v292_v1 = vrot.slane %v4584_v55, 1  ;;  %v4617_v2 = vld [vmem:[%s4451_s7 + $0x120] sm:$0xff] }
  0x25   : > { %6176 = vst [vmem:[#allocation13_spill] sm:$0xff] %v4609_v62  ;;  %v290_v63 = vrot.slane %v4597_v60, 1  ;;  %v4613_v0 = vld [vmem:[%s4451_s7 + $0x118] sm:$0x3]  ;;  %v4620_v6 = vld [vmem:[%s4451_s7 + $0x128] sm:$0xff]  ;;  %3836 = vmatprep.mubr.msk.f32.mxu1 %vm354_vm2, %v4591_v56  ;;  %v4625_v7 = vsel %vm271_vm1, %v323_v45, %v325_v51  ;;  %v4628_v9 = vsel %vm271_vm1, %v287_v52, %v288_v57  ;;  %v293_v12 = vrot.slane %v4600_v61, 1 }
  0x26   : > { %6177 = vst [vmem:[#allocation14_spill] sm:$0xff] %v4625_v7  ;;  %6178 = vst [vmem:[#allocation15_spill] sm:$0xff] %v4628_v9  ;;  %v330_v11 = vrot.slane %v4613_v0, 1  ;;  %v4633_v15 = vld [vmem:[%s4451_s7 + $0x70] sm:$0x3]  ;;  %v4639_v18 = vsel %vm271_vm1, %v327_v58, %v328_v59  ;;  %v332_v23 = vrot.slane %v4617_v2, 1 }
  0x27   : > { %v4636_v16 = vld [vmem:[%s4451_s7 + $0x130] sm:$0x3]  ;;  %6179 = vst [vmem:[#allocation16_spill] sm:$0xff] %v4639_v18  ;;  %v333_v24 = vrot.slane %v4620_v6, 1  ;;  %v4644_v25 = vld [vmem:[%s4451_s7 + $0x78] sm:$0xff]  ;;  %v4647_v30 = vld [vmem:[%s4451_s7 + $0x80] sm:$0xff]  ;;  %3813 = vmatmul.mubr.msk.f32.gmra.mxu0 %vm354_vm2, %v4609_v62  ;;  %v4662_v37 = vsel %vm271_vm1, %v288_v57, %v290_v63  ;;  %v4672_v50 = vsel %vm271_vm1, %v292_v1, %v293_v12 }
  0x28   : > { %v4652_v31 = vld [vmem:[%s4451_s7 + $0x138] sm:$0xff]  ;;  %v4655_v32 = vld [vmem:[%s4451_s7 + $0x140] sm:$0xff]  ;;  %3837 = vmatmul.mubr.msk.f32.gmra.mxu1 %vm354_vm2, %v4625_v7  ;;  %3815 = vmatprep.mubr.msk.f32.mxu0 %vm354_vm2, %v4628_v9  ;;  %6180 = vst [vmem:[#allocation17_spill] sm:$0xff] %v4662_v37  ;;  %v295_v38 = vrot.slane %v4633_v15, 1  ;;  %v335_v40 = vrot.slane %v4636_v16, 1  ;;  %v4669_v45 = vsel %vm271_vm1, %v328_v59, %v330_v11  ;;  %6182 = vst [vmem:[#allocation19_spill] sm:$0xff] %v4672_v50 }
  0x29   : > { %3839 = vmatprep.mubr.msk.f32.mxu1 %vm354_vm2, %v4639_v18  ;;  %6181 = vst [vmem:[#allocation18_spill] sm:$0xff] %v4669_v45  ;;  %v297_v51 = vrot.slane %v4644_v25, 1  ;;  %v298_v52 = vrot.slane %v4647_v30, 1  ;;  %v4677_v57 = vld [vmem:[%s4451_s7 + $0x88] sm:$0x3]  ;;  %v4683_v63 = vsel %vm271_vm1, %v332_v23, %v333_v24  ;;  %v337_v7 = vrot.slane %v4652_v31, 1 }
  0x2a   : > { %v4680_v58 = vld [vmem:[%s4451_s7 + $0x148] sm:$0x3]  ;;  %6183 = vst [vmem:[#allocation20_spill] sm:$0xff] %v4683_v63  ;;  %v338_v18 = vrot.slane %v4655_v32, 1  ;;  %v4688_v59 = vld [vmem:[%s4451_s7 + $0x90] sm:$0xff]  ;;  %v4691_v1 = vld [vmem:[%s4451_s7 + $0x98] sm:$0xff]  ;;  %v4706_v23 = vsel %vm271_vm1, %v293_v12, %v295_v38  ;;  %v4713_v29 = vsel %vm271_vm1, %v333_v24, %v335_v40 }
  0x2b   : > { %3816 = vmatmul.mubr.msk.f32.gmra.mxu0 %vm354_vm2, %v4662_v37  ;;  %v4696_v11 = vld [vmem:[%s4451_s7 + $0x150] sm:$0xff]  ;;  %v4699_v56 = vld [vmem:[%s4451_s7 + $0x158] sm:$0xff]  ;;  %6185 = vst [vmem:[#allocation22_spill] sm:$0xff] %v4706_v23  ;;  %v300_v44 = vrot.slane %v4677_v57, 1  ;;  %v340_v42 = vrot.slane %v4680_v58, 1  ;;  %6186 = vst [vmem:[#allocation23_spill] sm:$0xff] %v4713_v29 }
  0x2c   : > { %6184 = vst [vmem:[#allocation21_spill] sm:$0xff] %v4699_v56  ;;  %3840 = vmatmul.mubr.msk.f32.gmra.mxu1 %vm354_vm2, %v4669_v45  ;;  %3818 = vmatprep.mubr.msk.f32.mxu0 %vm354_vm2, %v4672_v50  ;;  %v4716_v45 = vsel %vm271_vm1, %v297_v51, %v298_v52  ;;  %v302_v22 = vrot.slane %v4688_v59, 1  ;;  %v303_v12 = vrot.slane %v4691_v1, 1  ;;  %v4721_v38 = vld [vmem:[%s4451_s7 + $0xa0] sm:$0x3]  ;;  %v4724_v50 = vsel %vm271_vm1, %v337_v7, %v338_v18  ;;  %v4732_v24 = vld [vmem:[%s4451_s7 + $0xa8] sm:$0xff] }
  0x2d   : > { %3842 = vmatprep.mubr.msk.f32.mxu1 %vm354_vm2, %v4683_v63  ;;  %6187 = vst [vmem:[#allocation24_spill] sm:$0xff] %v4716_v45  ;;  %6188 = vst [vmem:[#allocation25_spill] sm:$0xff] %v4724_v50  ;;  %v342_v37 = vrot.slane %v4696_v11, 1  ;;  %v343_v9 = vrot.slane %v4699_v56, 1  ;;  %v4729_v63 = vld [vmem:[%s4451_s7 + $0x160] sm:$0x3]  ;;  %v4750_v7 = vsel %vm271_vm1, %v298_v52, %v300_v44  ;;  %v4753_v49 = vsel %vm271_vm1, %v338_v18, %v340_v42 }
  0x2e   : > { %v4735_v40 = vld [vmem:[%s4451_s7 + $0xb0] sm:$0xff]  ;;  %v4740_v51 = vld [vmem:[%s4451_s7 + $0x168] sm:$0xff]  ;;  %6190 = vst [vmem:[#allocation27_spill] sm:$0xff] %v4750_v7  ;;  %6191 = vst [vmem:[#allocation28_spill] sm:$0xff] %v4753_v49  ;;  %v305_v43 = vrot.slane %v4721_v38, 1  ;;  %v345_v36 = vrot.slane %v4729_v63, 1 }
  0x2f   : > { %3819 = vmatmul.mubr.msk.f32.gmra.mxu0 %vm354_vm2, %v4706_v23  ;;  %v4743_v62 = vld [vmem:[%s4451_s7 + $0x170] sm:$0xff]  ;;  %v4759_v23 = vsel %vm271_vm1, %v302_v22, %v303_v12  ;;  %v4765_v56 = vld [vmem:[%s4451_s7 + $0xb8] sm:$0x3]  ;;  %v4768_v44 = vsel %vm271_vm1, %v342_v37, %v343_v9  ;;  %v347_v42 = vrot.slane %v4740_v51, 1  ;;  %s4306_s16 = scalar_lea.vmem %s4305_s20, 32 }
  0x30   : > { %6189 = vst [vmem:[#allocation26_spill] sm:$0xff] %v4743_v62  ;;  %3843 = vmatmul.mubr.msk.f32.gmra.mxu1 %vm354_vm2, %v4713_v29  ;;  %3821 = vmatprep.mubr.msk.f32.mxu0 %vm354_vm2, %v4716_v45  ;;  %6192 = vst [vmem:[#allocation29_spill] sm:$0xff] %v4759_v23  ;;  %v307_v29 = vrot.slane %v4732_v24, 1  ;;  %v308_v45 = vrot.slane %v4735_v40, 1  ;;  %v348_v18 = vrot.slane %v4743_v62, 1  ;;  %v4782_v22 = vsel %vm271_vm1, %v303_v12, %v305_v43 }
  0x31   : > { %3845 = vmatprep.mubr.msk.f32.mxu1 %vm354_vm2, %v4724_v50  ;;  %6193 = vst [vmem:[#allocation30_spill] sm:$0xff] %v4768_v44  ;;  %v4773_v52 = vld [vmem:[%s4451_s7 + $0x178] sm:$0x3]  ;;  %6194 = vst [vmem:[#allocation31_spill] sm:$0xff] %v4782_v22  ;;  %v310_v37 = vrot.slane %v4765_v56, 1  ;;  %v941_v50 = vrot.slane %v4454_v3, 2  ;;  %v4789_v62 = vsel %vm271_vm1, %v343_v9, %v345_v36 }
  0x32   : > { %6195 = vst [vmem:[#allocation32_spill] sm:$0xff] %v4789_v62  ;;  %v4797_v43 = vsel %vm271_vm1, %v347_v42, %v348_v18  ;;  %v944_v12 = vrot.slane %v4469_v10, 2  ;;  %v946_v10 = vrot.slane %v4477_v14, 2  ;;  %v947_v42 = vrot.slane %v4482_v17, 2 }
  0x33   : > { %3822 = vmatmul.mubr.msk.f32.gmra.mxu0 %vm354_vm2, %v4750_v7  ;;  %v4792_v7 = vsel %vm271_vm1, %v307_v29, %v308_v45  ;;  %6197 = vst [vmem:[#allocation34_spill] sm:$0xff] %v4797_v43  ;;  %v4807_v29 = vsel %vm271_vm1, %v308_v45, %v310_v37  ;;  %v949_v37 = vrot.slane %v4504_v26, 2  ;;  %v954_v26 = vrot.slane %v4545_v41, 2 }
  0x34   : > { %3846 = vmatmul.mubr.msk.f32.gmra.mxu1 %vm354_vm2, %v4753_v49  ;;  %3824 = vmatprep.mubr.msk.f32.mxu0 %vm354_vm2, %v4759_v23  ;;  %6196 = vst [vmem:[#allocation33_spill] sm:$0xff] %v4792_v7  ;;  %v350_v49 = vrot.slane %v4773_v52, 1  ;;  %v942_v23 = vrot.slane %v4457_v4, 2  ;;  %6198 = vst [vmem:[#allocation35_spill] sm:$0xff] %v4807_v29  ;;  %v959_v41 = vrot.slane %v4597_v60, 2 }
  0x35   : > { %3848 = vmatprep.mubr.msk.f32.mxu1 %vm354_vm2, %v4768_v44 }
  0x36   : > { %v4812_v36 = vsel %vm271_vm1, %v348_v18, %v350_v49  ;;  %v943_v9 = vsel %vm940_vm3, %v941_v50, %v942_v23  ;;  %v945_v45 = vsel %vm940_vm3, %v942_v23, %v944_v12  ;;  %v951_v49 = vrot.slane %v4524_v33, 2  ;;  %v4848_v23 = vld [vmem:[%s6081_s1 + $0x18] sm:$0xf] }
  0x37   : > { %3825 = vmatmul.mubr.msk.f32.gmra.mxu0 %vm354_vm2, %v4782_v22  ;;  %6199 = vst [vmem:[#allocation36_spill] sm:$0xff] %v4812_v36  ;;  %v952_v50 = vrot.slane %v4527_v34, 2  ;;  %v4830_v18 = vsel %vm940_vm3, %v946_v10, %v947_v42  ;;  %v957_v12 = vrot.slane %v4567_v48, 2 }
  0x38   : > { %3849 = vmatmul.mubr.msk.f32.gmra.mxu1 %vm354_vm2, %v4789_v62  ;;  %3827 = vmatprep.mubr.msk.f32.mxu0 %vm354_vm2, %v4792_v7 }
  0x39   : > { %3851 = vmatprep.mubr.msk.f32.mxu1 %vm354_vm2, %v4797_v43  ;;  %v4889_v60 = vsel %vm940_vm3, %v957_v12, %v959_v41  ;;  %v971_v41 = vrot.slane %v4688_v59, 2 }
  0x3b   : > { %3828 = vmatmul.mubr.msk.f32.gmra.mxu0 %vm354_vm2, %v4807_v29 }
  0x3c   : > { %3852 = vmatmul.mubr.msk.f32.gmra.mxu1 %vm354_vm2, %v4812_v36  ;;  %3906 = vmatprep.mubr.msk.f32.mxu0 %vm354_vm2, %v943_v9  ;;  %v4835_v9 = vld [vmem:[%s6081_s1 + $0x14] sm:$0xf] }
  0x3d   : > { %3856 = vmatprep.mubr.msk.f32.mxu1 %vm354_vm2, %v4454_v3  ;;  %v4842_v3 = vsel %vm940_vm3, %v947_v42, %v949_v37  ;;  %v961_v42 = vrot.slane %v4584_v55, 2  ;;  %v964_v37 = vrot.slane %v4633_v15, 2 }
  0x3f   : > { %3907 = vmatmul.mubr.msk.f32.vlgmr.msra.gmra.mxu0 %vm354_vm2, %v945_v45  ;;  %v962_v45 = vrot.slane %v4600_v61, 2 }
  0x40   : > { %3857 = vmatmul.mubr.msk.f32.vlgmr.msra.gmra.mxu1 %vm354_vm2, %v4457_v4  ;;  %4005 = vmatpush3.msk.msra.mxu0 %vm419_vm0, %v4512_v28  ;;  %v4855_v4 = vsel %vm940_vm3, %v951_v49, %v952_v50  ;;  %v956_v28 = vrot.slane %v4564_v47, 2 }
  0x41   : > { %3955 = vmatpush3.msk.msra.mxu1 %vm419_vm0, %v4494_v21  ;;  %3859 = vmatprep.mubr.msk.f32.mxu1 %vm354_vm2, %v4477_v14  ;;  %v4872_v21 = vsel %vm940_vm3, %v952_v50, %v954_v26  ;;  %v4895_v49 = vsel %vm940_vm3, %v961_v42, %v962_v45  ;;  %v966_v50 = vrot.slane %v4644_v25, 2  ;;  %v967_v26 = vrot.slane %v4647_v30, 2 }
  0x42   : > { %3909 = vmatprep.mubr.msk.f32.mxu0 %vm354_vm2, %v4830_v18  ;;  %4054 = vmatprep.subr.msk.mxu1 %vm419_vm0, %v4835_v9  ;;  %v4878_v10 = vsel %vm940_vm3, %v956_v28, %v957_v12  ;;  %v4906_v15 = vsel %vm940_vm3, %v962_v45, %v964_v37  ;;  %v969_v28 = vrot.slane %v4677_v57, 2  ;;  %v972_v42 = vrot.slane %v4691_v1, 2 }
  0x43   : > { %3910 = vmatmul.mubr.msk.f32.gmra.mxu0 %vm354_vm2, %v4842_v3  ;;  %4104 = vmatprep.subr.msk.mxu0 %vm419_vm0, %v4848_v23  ;;  %6200 = vst [vmem:[#allocation37_spill] sm:$0xff] %v4906_v15  ;;  %v4912_v12 = vsel %vm940_vm3, %v966_v50, %v967_v26  ;;  %v974_v45 = vrot.slane %v4721_v38, 2  ;;  %v976_v50 = vrot.slane %v4732_v24, 2 }
  0x44   : > { %3860 = vmatmul.mubr.msk.f32.gmra.mxu1 %vm354_vm2, %v4482_v17  ;;  %3912 = vmatprep.mubr.msk.f32.mxu0 %vm354_vm2, %v4855_v4  ;;  %v4923_v57 = vsel %vm940_vm3, %v967_v26, %v969_v28  ;;  %v4929_v37 = vsel %vm940_vm3, %v971_v41, %v972_v42  ;;  %v979_v26 = vrot.slane %v4765_v56, 2  ;;  %v981_v41 = vrot.slane %v4460_v5, 2 }
  0x45   : > { %3862 = vmatprep.mubr.msk.f32.mxu1 %vm354_vm2, %v4524_v33  ;;  %6201 = vst [vmem:[#allocation38_spill] sm:$0xff] %v4923_v57  ;;  %v4940_v38 = vsel %vm940_vm3, %v972_v42, %v974_v45  ;;  %v984_v42 = vrot.slane %v4474_v13, 2 }
  0x46   : > { %6202 = vst [vmem:[#allocation39_spill] sm:$0xff] %v4940_v38 }
  0x47   : > { %3913 = vmatmul.mubr.msk.f32.gmra.mxu0 %vm354_vm2, %v4872_v21 }
  0x48   : > { %3863 = vmatmul.mubr.msk.f32.gmra.mxu1 %vm354_vm2, %v4527_v34  ;;  %3915 = vmatprep.mubr.msk.f32.mxu0 %vm354_vm2, %v4878_v10 }
  0x49   : > { %3865 = vmatprep.mubr.msk.f32.mxu1 %vm354_vm2, %v4564_v47 }
  0x4b   : > { %3916 = vmatmul.mubr.msk.f32.gmra.mxu0 %vm354_vm2, %v4889_v60 }
  0x4c   : > { %3866 = vmatmul.mubr.msk.f32.gmra.mxu1 %vm354_vm2, %v4567_v48  ;;  %3918 = vmatprep.mubr.msk.f32.mxu0 %vm354_vm2, %v4895_v49 }
  0x4d   : > { %3868 = vmatprep.mubr.msk.f32.mxu1 %vm354_vm2, %v4584_v55 }
  0x4f   : > { %3919 = vmatmul.mubr.msk.f32.gmra.mxu0 %vm354_vm2, %v4906_v15  ;;  %v977_v15 = vrot.slane %v4735_v40, 2 }
  0x50   : > { %3869 = vmatmul.mubr.msk.f32.gmra.mxu1 %vm354_vm2, %v4600_v61  ;;  %3921 = vmatprep.mubr.msk.f32.mxu0 %vm354_vm2, %v4912_v12 }
  0x51   : > { %3871 = vmatprep.mubr.msk.f32.mxu1 %vm354_vm2, %v4644_v25  ;;  %v4946_v28 = vsel %vm940_vm3, %v976_v50, %v977_v15  ;;  %v4957_v56 = vsel %vm940_vm3, %v977_v15, %v979_v26  ;;  %v986_v50 = vrot.slane %v4486_v19, 2  ;;  %v989_v15 = vrot.slane %v4507_v27, 2 }
  0x52   : > { %6203 = vst [vmem:[#allocation40_spill] sm:$0xff] %v4957_v56 }
  0x53   : > { %3922 = vmatmul.mubr.msk.f32.gmra.mxu0 %vm354_vm2, %v4923_v57  ;;  %v982_v57 = vrot.slane %v4465_v8, 2 }
  0x54   : > { %3872 = vmatmul.mubr.msk.f32.gmra.mxu1 %vm354_vm2, %v4647_v30  ;;  %3924 = vmatprep.mubr.msk.f32.mxu0 %vm354_vm2, %v4929_v37 }
  0x55   : > { %3874 = vmatprep.mubr.msk.f32.mxu1 %vm354_vm2, %v4688_v59  ;;  %v4963_v45 = vsel %vm940_vm3, %v981_v41, %v982_v57  ;;  %v4974_v13 = vsel %vm940_vm3, %v982_v57, %v984_v42  ;;  %v991_v41 = vrot.slane %v4530_v35, 2  ;;  %v994_v57 = vrot.slane %v4561_v46, 2 }
  0x56   : > { %6204 = vst [vmem:[#allocation41_spill] sm:$0xff] %v4974_v13 }
  0x57   : > { %3925 = vmatmul.mubr.msk.f32.gmra.mxu0 %vm354_vm2, %v4940_v38  ;;  %v987_v38 = vrot.slane %v4489_v20, 2 }
  0x58   : > { %3875 = vmatmul.mubr.msk.f32.gmra.mxu1 %vm354_vm2, %v4691_v1  ;;  %3927 = vmatprep.mubr.msk.f32.mxu0 %vm354_vm2, %v4946_v28 }
  0x59   : > { %3877 = vmatprep.mubr.msk.f32.mxu1 %vm354_vm2, %v4732_v24  ;;  %v4980_v26 = vsel %vm940_vm3, %v986_v50, %v987_v38  ;;  %v4991_v27 = vsel %vm940_vm3, %v987_v38, %v989_v15  ;;  %v996_v50 = vrot.slane %v4578_v53, 2  ;;  %v999_v38 = vrot.slane %v4613_v0, 2 }
  0x5a   : > { %6205 = vst [vmem:[#allocation42_spill] sm:$0xff] %v4991_v27 }
  0x5b   : > { %3928 = vmatmul.mubr.msk.f32.gmra.mxu0 %vm354_vm2, %v4957_v56  ;;  %v992_v56 = vrot.slane %v4541_v39, 2 }
  0x5c   : > { %3878 = vmatmul.mubr.msk.f32.gmra.mxu1 %vm354_vm2, %v4735_v40  ;;  %3930 = vmatprep.mubr.msk.f32.mxu0 %vm354_vm2, %v4963_v45 }
  0x5d   : > { %3880 = vmatprep.mubr.msk.f32.mxu1 %vm354_vm2, %v4460_v5  ;;  %v4997_v42 = vsel %vm940_vm3, %v991_v41, %v992_v56  ;;  %v5008_v46 = vsel %vm940_vm3, %v992_v56, %v994_v57  ;;  %v1001_v41 = vrot.slane %v4617_v2, 2  ;;  %v1004_v56 = vrot.slane %v4636_v16, 2 }
  0x5e   : > { %6206 = vst [vmem:[#allocation43_spill] sm:$0xff] %v5008_v46 }
  0x5f   : > { %3931 = vmatmul.mubr.msk.f32.gmra.mxu0 %vm354_vm2, %v4974_v13  ;;  %v997_v13 = vrot.slane %v4581_v54, 2 }
  0x60   : > { %3881 = vmatmul.mubr.msk.f32.gmra.mxu1 %vm354_vm2, %v4465_v8  ;;  %3933 = vmatprep.mubr.msk.f32.mxu0 %vm354_vm2, %v4980_v26 }
  0x61   : > { %3883 = vmatprep.mubr.msk.f32.mxu1 %vm354_vm2, %v4486_v19  ;;  %v5014_v15 = vsel %vm940_vm3, %v996_v50, %v997_v13  ;;  %v5025_v0 = vsel %vm940_vm3, %v997_v13, %v999_v38  ;;  %v1006_v50 = vrot.slane %v4652_v31, 2  ;;  %v1009_v13 = vrot.slane %v4680_v58, 2 }
  0x62   : > { %6207 = vst [vmem:[#allocation44_spill] sm:$0xff] %v5014_v15  ;;  %6208 = vst [vmem:[#allocation45_spill] sm:$0xff] %v5025_v0 }
  0x63   : > { %3934 = vmatmul.mubr.msk.f32.gmra.mxu0 %vm354_vm2, %v4991_v27  ;;  %v1002_v27 = vrot.slane %v4620_v6, 2 }
  0x64   : > { %3884 = vmatmul.mubr.msk.f32.gmra.mxu1 %vm354_vm2, %v4489_v20  ;;  %3936 = vmatprep.mubr.msk.f32.mxu0 %vm354_vm2, %v4997_v42 }
  0x65   : > { %3886 = vmatprep.mubr.msk.f32.mxu1 %vm354_vm2, %v4530_v35  ;;  %v5031_v57 = vsel %vm940_vm3, %v1001_v41, %v1002_v27  ;;  %v5042_v16 = vsel %vm940_vm3, %v1002_v27, %v1004_v56  ;;  %v1011_v41 = vrot.slane %v4696_v11, 2  ;;  %v1014_v27 = vrot.slane %v4729_v63, 2 }
  0x66   : > { %6209 = vst [vmem:[#allocation46_spill] sm:$0xff] %v5031_v57  ;;  %6210 = vst [vmem:[#allocation47_spill] sm:$0xff] %v5042_v16 }
  0x67   : > { %3937 = vmatmul.mubr.msk.f32.gmra.mxu0 %vm354_vm2, %v5008_v46  ;;  %v1007_v46 = vrot.slane %v4655_v32, 2 }
  0x68   : > { %3887 = vmatmul.mubr.msk.f32.gmra.mxu1 %vm354_vm2, %v4541_v39  ;;  %3939 = vmatprep.mubr.msk.f32.mxu0 %vm354_vm2, %v5014_v15 }
  0x69   : > { %3889 = vmatprep.mubr.msk.f32.mxu1 %vm354_vm2, %v4578_v53  ;;  %v5048_v38 = vsel %vm940_vm3, %v1006_v50, %v1007_v46  ;;  %v5059_v58 = vsel %vm940_vm3, %v1007_v46, %v1009_v13  ;;  %v1016_v50 = vrot.slane %v4740_v51, 2  ;;  %v1019_v46 = vrot.slane %v4773_v52, 2  ;;  %v6214_v52 = vld [vmem:[#allocation7_spill] sm:$0xff] }
  0x6b   : > { %3940 = vmatmul.mubr.msk.f32.gmra.mxu0 %vm354_vm2, %v5025_v0  ;;  %v6211_v0 = vld [vmem:[#allocation21_spill] sm:$0xff] }
  0x6c   : > { %3890 = vmatmul.mubr.msk.f32.gmra.mxu1 %vm354_vm2, %v4581_v54  ;;  %3942 = vmatprep.mubr.msk.f32.mxu0 %vm354_vm2, %v5031_v57  ;;  %v1012_v15 = vrot.slane %v6211_v0, 2 }
  0x6d   : > { %3892 = vmatprep.mubr.msk.f32.mxu1 %vm354_vm2, %v4617_v2 }
  0x6e   : > { %v5065_v56 = vsel %vm940_vm3, %v1011_v41, %v1012_v15  ;;  %v5076_v63 = vsel %vm940_vm3, %v1012_v15, %v1014_v27  ;;  %v6215_v41 = vld [vmem:[#allocation9_spill] sm:$0xff] }
  0x6f   : > { %3943 = vmatmul.mubr.msk.f32.gmra.mxu0 %vm354_vm2, %v5042_v16  ;;  %v6212_v16 = vld [vmem:[#allocation26_spill] sm:$0xff]  ;;  %v5117_v27 = vld [vmem:[%s6081_s1 + $0x20] sm:$0xf] }
  0x70   : > { %3893 = vmatmul.mubr.msk.f32.gmra.mxu1 %vm354_vm2, %v4620_v6  ;;  %3945 = vmatprep.mubr.msk.f32.mxu0 %vm354_vm2, %v5048_v38  ;;  %v1017_v57 = vrot.slane %v6212_v16, 2 }
  0x71   : > { %3895 = vmatprep.mubr.msk.f32.mxu1 %vm354_vm2, %v4652_v31 }
  0x72   : > { %v5082_v13 = vsel %vm940_vm3, %v1016_v50, %v1017_v57  ;;  %v5091_v15 = vsel %vm940_vm3, %v1017_v57, %v1019_v46  ;;  %v5108_v57 = vld [vmem:[%s6081_s1 + $0x1c] sm:$0xf]  ;;  %v6220_v50 = vld [vmem:[#allocation19_spill] sm:$0xff]  ;;  %v6221_v46 = vld [vmem:[#allocation22_spill] sm:$0xff] }
  0x73   : > { %3946 = vmatmul.mubr.msk.f32.gmra.mxu0 %vm354_vm2, %v5059_v58  ;;  %6213 = vst [vmem:[#allocation21_spill] sm:$0xff] %v5091_v15 }
  0x74   : > { %3896 = vmatmul.mubr.msk.f32.gmra.mxu1 %vm354_vm2, %v4655_v32  ;;  %3948 = vmatprep.mubr.msk.f32.mxu0 %vm354_vm2, %v5065_v56 }
  0x75   : > { %3898 = vmatprep.mubr.msk.f32.mxu1 %vm354_vm2, %v4696_v11 }
  0x77   : > { %3949 = vmatmul.mubr.msk.f32.gmra.mxu0 %vm354_vm2, %v5076_v63 }
  0x78   : > { %3899 = vmatmul.mubr.msk.f32.gmra.mxu1 %vm354_vm2, %v6211_v0  ;;  %3951 = vmatprep.mubr.msk.f32.mxu0 %vm354_vm2, %v5082_v13 }
  0x79   : > { %3901 = vmatprep.mubr.msk.f32.mxu1 %vm354_vm2, %v4740_v51 }
  0x7b   : > { %3952 = vmatmul.mubr.msk.f32.gmra.mxu0 %vm354_vm2, %v5091_v15 }
  0x7c   : > { %3902 = vmatmul.mubr.msk.f32.gmra.mxu1 %vm354_vm2, %v6212_v16  ;;  %4006 = vmatprep.mubr.msk.f32.mxu0 %vm354_vm2, %v6214_v52  ;;  %v6222_v52 = vld [vmem:[#allocation24_spill] sm:$0xff] }
  0x7d   : > { %3956 = vmatprep.mubr.msk.f32.mxu1 %vm354_vm2, %v4477_v14  ;;  %v6216_v14 = vld [vmem:[#allocation11_spill] sm:$0xff] }
  0x7f   : > { %4007 = vmatmul.mubr.msk.f32.vlgmr.msra.gmra.mxu0 %vm354_vm2, %v6215_v41  ;;  %v6223_v41 = vld [vmem:[#allocation27_spill] sm:$0xff] }
  0x80   : > { %3957 = vmatmul.mubr.msk.f32.vlgmr.msra.gmra.mxu1 %vm354_vm2, %v4482_v17  ;;  %4105 = vmatpush3.msk.msra.mxu0 %vm419_vm0, %v4848_v23  ;;  %v6217_v17 = vld [vmem:[#allocation13_spill] sm:$0xff]  ;;  %v6218_v23 = vld [vmem:[#allocation15_spill] sm:$0xff] }
  0x81   : > { %4055 = vmatpush3.msk.msra.mxu1 %vm419_vm0, %v4835_v9  ;;  %3959 = vmatprep.mubr.msk.f32.mxu1 %vm354_vm2, %v4524_v33  ;;  %v6219_v9 = vld [vmem:[#allocation17_spill] sm:$0xff] }
  0x82   : > { %4009 = vmatprep.mubr.msk.f32.mxu0 %vm354_vm2, %v6216_v14  ;;  %4154 = vmatprep.subr.msk.mxu1 %vm419_vm0, %v5108_v57 }
  0x83   : > { %4010 = vmatmul.mubr.msk.f32.gmra.mxu0 %vm354_vm2, %v6217_v17  ;;  %4204 = vmatprep.subr.msk.mxu0 %vm419_vm0, %v5117_v27 }
  0x84   : > { %3960 = vmatmul.mubr.msk.f32.gmra.mxu1 %vm354_vm2, %v4527_v34  ;;  %4012 = vmatprep.mubr.msk.f32.mxu0 %vm354_vm2, %v6218_v23 }
  0x85   : > { %3962 = vmatprep.mubr.msk.f32.mxu1 %vm354_vm2, %v4564_v47 }
  0x87   : > { %4013 = vmatmul.mubr.msk.f32.gmra.mxu0 %vm354_vm2, %v6219_v9 }
  0x88   : > { %3963 = vmatmul.mubr.msk.f32.gmra.mxu1 %vm354_vm2, %v4567_v48  ;;  %4015 = vmatprep.mubr.msk.f32.mxu0 %vm354_vm2, %v6220_v50  ;;  %v6224_v50 = vld [vmem:[#allocation29_spill] sm:$0xff] }
  0x89   : > { %3965 = vmatprep.mubr.msk.f32.mxu1 %vm354_vm2, %v4584_v55 }
  0x8b   : > { %4016 = vmatmul.mubr.msk.f32.gmra.mxu0 %vm354_vm2, %v6221_v46 }
  0x8c   : > { %3966 = vmatmul.mubr.msk.f32.gmra.mxu1 %vm354_vm2, %v4600_v61  ;;  %4018 = vmatprep.mubr.msk.f32.mxu0 %vm354_vm2, %v6222_v52  ;;  %v5234_v52 = vld [vmem:[%s4451_s7 + $0x190] sm:$0x3] }
  0x8d   : > { %3968 = vmatprep.mubr.msk.f32.mxu1 %vm354_vm2, %v4644_v25 }
  0x8f   : > { %4019 = vmatmul.mubr.msk.f32.gmra.mxu0 %vm354_vm2, %v6223_v41  ;;  %v5221_v41 = vld [vmem:[%s4451_s7 + $0x188] sm:$0xff] }
  0x90   : > { %3969 = vmatmul.mubr.msk.f32.gmra.mxu1 %vm354_vm2, %v4647_v30  ;;  %4021 = vmatprep.mubr.msk.f32.mxu0 %vm354_vm2, %v6224_v50  ;;  %v6225_v50 = vld [vmem:[#allocation5_spill] sm:$0xff] }
  0x91   : > { %3971 = vmatprep.mubr.msk.f32.mxu1 %vm354_vm2, %v4688_v59 }
  0x93   : > { %4022 = vmatmul.mubr.msk.f32.gmra.mxu0 %vm354_vm2, %v4782_v22  ;;  %v6226_v22 = vld [vmem:[#allocation6_spill] sm:$0xff] }
  0x94   : > { %3972 = vmatmul.mubr.msk.f32.gmra.mxu1 %vm354_vm2, %v4691_v1  ;;  %4024 = vmatprep.mubr.msk.f32.mxu0 %vm354_vm2, %v4792_v7  ;;  %v6227_v7 = vld [vmem:[#allocation8_spill] sm:$0xff] }
  0x95   : > { %3974 = vmatprep.mubr.msk.f32.mxu1 %vm354_vm2, %v4732_v24 }
  0x97   : > { %4025 = vmatmul.mubr.msk.f32.gmra.mxu0 %vm354_vm2, %v4807_v29  ;;  %v6228_v29 = vld [vmem:[#allocation10_spill] sm:$0xff] }
  0x98   : > { %3975 = vmatmul.mubr.msk.f32.gmra.mxu1 %vm354_vm2, %v4735_v40  ;;  %4027 = vmatprep.mubr.msk.f32.mxu0 %vm354_vm2, %v6225_v50  ;;  %v6229_v50 = vld [vmem:[#allocation12_spill] sm:$0xff] }
  0x99   : > { %3977 = vmatprep.mubr.msk.f32.mxu1 %vm354_vm2, %v4460_v5 }
  0x9b   : > { %4028 = vmatmul.mubr.msk.f32.gmra.mxu0 %vm354_vm2, %v6226_v22  ;;  %v6230_v22 = vld [vmem:[#allocation14_spill] sm:$0xff] }
  0x9c   : > { %3978 = vmatmul.mubr.msk.f32.gmra.mxu1 %vm354_vm2, %v4465_v8  ;;  %4030 = vmatprep.mubr.msk.f32.mxu0 %vm354_vm2, %v6227_v7  ;;  %v6231_v7 = vld [vmem:[#allocation16_spill] sm:$0xff] }
  0x9d   : > { %3980 = vmatprep.mubr.msk.f32.mxu1 %vm354_vm2, %v4486_v19 }
  0x9f   : > { %4031 = vmatmul.mubr.msk.f32.gmra.mxu0 %vm354_vm2, %v6228_v29  ;;  %v6232_v29 = vld [vmem:[#allocation18_spill] sm:$0xff] }
  0xa0   : > { %3981 = vmatmul.mubr.msk.f32.gmra.mxu1 %vm354_vm2, %v4489_v20  ;;  %4033 = vmatprep.mubr.msk.f32.mxu0 %vm354_vm2, %v6229_v50  ;;  %v6233_v50 = vld [vmem:[#allocation20_spill] sm:$0xff] }
  0xa1   : > { %3983 = vmatprep.mubr.msk.f32.mxu1 %vm354_vm2, %v4530_v35 }
  0xa3   : > { %4034 = vmatmul.mubr.msk.f32.gmra.mxu0 %vm354_vm2, %v6230_v22  ;;  %v6234_v22 = vld [vmem:[#allocation23_spill] sm:$0xff] }
  0xa4   : > { %3984 = vmatmul.mubr.msk.f32.gmra.mxu1 %vm354_vm2, %v4541_v39  ;;  %4036 = vmatprep.mubr.msk.f32.mxu0 %vm354_vm2, %v6231_v7  ;;  %v6235_v7 = vld [vmem:[#allocation25_spill] sm:$0xff] }
  0xa5   : > { %3986 = vmatprep.mubr.msk.f32.mxu1 %vm354_vm2, %v4578_v53 }
  0xa7   : > { %4037 = vmatmul.mubr.msk.f32.gmra.mxu0 %vm354_vm2, %v6232_v29  ;;  %v5218_v29 = vld [vmem:[%s4451_s7 + $0x180] sm:$0xff] }
  0xa8   : > { %3987 = vmatmul.mubr.msk.f32.gmra.mxu1 %vm354_vm2, %v4581_v54  ;;  %4039 = vmatprep.mubr.msk.f32.mxu0 %vm354_vm2, %v6233_v50  ;;  %v6236_v50 = vld [vmem:[#allocation28_spill] sm:$0xff] }
  0xa9   : > { %3989 = vmatprep.mubr.msk.f32.mxu1 %vm354_vm2, %v4617_v2 }
  0xab   : > { %4040 = vmatmul.mubr.msk.f32.gmra.mxu0 %vm354_vm2, %v6234_v22  ;;  %v1617_v22 = vrot.slane %v5221_v41, 1 }
  0xac   : > { %3990 = vmatmul.mubr.msk.f32.gmra.mxu1 %vm354_vm2, %v4620_v6  ;;  %4042 = vmatprep.mubr.msk.f32.mxu0 %vm354_vm2, %v6235_v7  ;;  %v1616_v7 = vrot.slane %v5218_v29, 1 }
  0xad   : > { %3992 = vmatprep.mubr.msk.f32.mxu1 %vm354_vm2, %v4652_v31 }
  0xaf   : > { %4043 = vmatmul.mubr.msk.f32.gmra.mxu0 %vm354_vm2, %v6236_v50  ;;  %v5246_v50 = vsel %vm271_vm1, %v1616_v7, %v1617_v22 }
  0xb0   : > { %3993 = vmatmul.mubr.msk.f32.gmra.mxu1 %vm354_vm2, %v4655_v32  ;;  %4045 = vmatprep.mubr.msk.f32.mxu0 %vm354_vm2, %v4768_v44  ;;  %v1619_v44 = vrot.slane %v5234_v52, 1  ;;  %6237 = vst [vmem:[#allocation26_spill] sm:$0xff] %v5246_v50 }
  0xb1   : > { %3995 = vmatprep.mubr.msk.f32.mxu1 %vm354_vm2, %v4696_v11 }
  0xb3   : > { %4046 = vmatmul.mubr.msk.f32.gmra.mxu0 %vm354_vm2, %v4789_v62  ;;  %v5255_v62 = vsel %vm271_vm1, %v1617_v22, %v1619_v44  ;;  %v6249_v22 = vld [vmem:[#allocation47_spill] sm:$0xff] }
  0xb4   : > { %3996 = vmatmul.mubr.msk.f32.gmra.mxu1 %vm354_vm2, %v6211_v0  ;;  %4048 = vmatprep.mubr.msk.f32.mxu0 %vm354_vm2, %v4797_v43  ;;  %6238 = vst [vmem:[#allocation7_spill] sm:$0xff] %v5255_v62 }
  0xb5   : > { %3998 = vmatprep.mubr.msk.f32.mxu1 %vm354_vm2, %v4740_v51 }
  0xb7   : > { %4049 = vmatmul.mubr.msk.f32.gmra.mxu0 %vm354_vm2, %v4812_v36  ;;  %v5432_v36 = vld [vmem:[%s4451_s7 + $0x198] sm:$0xff] }
  0xb8   : > { %3999 = vmatmul.mubr.msk.f32.gmra.mxu1 %vm354_vm2, %v6212_v16  ;;  %4051 = vmatprep.mubr.msk.f32.mxu0 %vm354_vm2, %v5246_v50 }
  0xb9   : > { %4001 = vmatprep.mubr.msk.f32.mxu1 %vm354_vm2, %v5218_v29 }
  0xbb   : > { %4052 = vmatmul.mubr.msk.f32.gmra.mxu0 %vm354_vm2, %v5255_v62 }
  0xbc   : > { %4002 = vmatmul.mubr.msk.f32.gmra.mxu1 %vm354_vm2, %v5221_v41  ;;  %4106 = vmatprep.mubr.msk.f32.mxu0 %vm354_vm2, %v4524_v33  ;;  %v6239_v33 = vld [vmem:[#allocation37_spill] sm:$0xff] }
  0xbd   : > { %4056 = vmatprep.mubr.msk.f32.mxu1 %vm354_vm2, %v4830_v18 }
  0xbf   : > { %4107 = vmatmul.mubr.msk.f32.vlgmr.msra.gmra.mxu0 %vm354_vm2, %v4527_v34  ;;  %v6240_v34 = vld [vmem:[#allocation38_spill] sm:$0xff] }
  0xc0   : > { %4057 = vmatmul.mubr.msk.f32.vlgmr.msra.gmra.mxu1 %vm354_vm2, %v4842_v3  ;;  %4205 = vmatpush3.msk.msra.mxu0 %vm419_vm0, %v5117_v27 }
  0xc1   : > { %4155 = vmatpush3.msk.msra.mxu1 %vm419_vm0, %v5108_v57  ;;  %4059 = vmatprep.mubr.msk.f32.mxu1 %vm354_vm2, %v4855_v4  ;;  %v1887_v57 = vrot.slane %v5218_v29, 2 }
  0xc2   : > { %4109 = vmatprep.mubr.msk.f32.mxu0 %vm354_vm2, %v4564_v47  ;;  %v6241_v47 = vld [vmem:[#allocation39_spill] sm:$0xff] }
  0xc3   : > { %4110 = vmatmul.mubr.msk.f32.gmra.mxu0 %vm354_vm2, %v4567_v48  ;;  %v6242_v48 = vld [vmem:[#allocation40_spill] sm:$0xff] }
  0xc4   : > { %4060 = vmatmul.mubr.msk.f32.gmra.mxu1 %vm354_vm2, %v4872_v21  ;;  %4112 = vmatprep.mubr.msk.f32.mxu0 %vm354_vm2, %v4584_v55  ;;  %v6243_v55 = vld [vmem:[#allocation41_spill] sm:$0xff] }
  0xc5   : > { %4062 = vmatprep.mubr.msk.f32.mxu1 %vm354_vm2, %v4878_v10 }
  0xc7   : > { %4113 = vmatmul.mubr.msk.f32.gmra.mxu0 %vm354_vm2, %v4600_v61 }
  0xc8   : > { %4063 = vmatmul.mubr.msk.f32.gmra.mxu1 %vm354_vm2, %v4889_v60  ;;  %4115 = vmatprep.mubr.msk.f32.mxu0 %vm354_vm2, %v4644_v25  ;;  %v6245_v25 = vld [vmem:[#allocation43_spill] sm:$0xff] }
  0xc9   : > { %4065 = vmatprep.mubr.msk.f32.mxu1 %vm354_vm2, %v4895_v49 }
  0xcb   : > { %4116 = vmatmul.mubr.msk.f32.gmra.mxu0 %vm354_vm2, %v4647_v30  ;;  %v6246_v30 = vld [vmem:[#allocation44_spill] sm:$0xff] }
  0xcc   : > { %4066 = vmatmul.mubr.msk.f32.gmra.mxu1 %vm354_vm2, %v6239_v33  ;;  %4118 = vmatprep.mubr.msk.f32.mxu0 %vm354_vm2, %v4688_v59 }
  0xcd   : > { %4068 = vmatprep.mubr.msk.f32.mxu1 %vm354_vm2, %v4912_v12 }
  0xcf   : > { %4119 = vmatmul.mubr.msk.f32.gmra.mxu0 %vm354_vm2, %v4691_v1 }
  0xd0   : > { %4069 = vmatmul.mubr.msk.f32.gmra.mxu1 %vm354_vm2, %v6240_v34  ;;  %4121 = vmatprep.mubr.msk.f32.mxu0 %vm354_vm2, %v4732_v24  ;;  %v6247_v24 = vld [vmem:[#allocation45_spill] sm:$0xff] }
  0xd1   : > { %4071 = vmatprep.mubr.msk.f32.mxu1 %vm354_vm2, %v4929_v37 }
  0xd3   : > { %4122 = vmatmul.mubr.msk.f32.gmra.mxu0 %vm354_vm2, %v4735_v40  ;;  %v6248_v40 = vld [vmem:[#allocation46_spill] sm:$0xff] }
  0xd4   : > { %4072 = vmatmul.mubr.msk.f32.gmra.mxu1 %vm354_vm2, %v6241_v47  ;;  %4124 = vmatprep.mubr.msk.f32.mxu0 %vm354_vm2, %v4460_v5 }
  0xd5   : > { %4074 = vmatprep.mubr.msk.f32.mxu1 %vm354_vm2, %v4946_v28 }
  0xd7   : > { %4125 = vmatmul.mubr.msk.f32.gmra.mxu0 %vm354_vm2, %v4465_v8 }
  0xd8   : > { %4075 = vmatmul.mubr.msk.f32.gmra.mxu1 %vm354_vm2, %v6242_v48  ;;  %4127 = vmatprep.mubr.msk.f32.mxu0 %vm354_vm2, %v4486_v19  ;;  %v6244_v19 = vld [vmem:[#allocation42_spill] sm:$0xff] }
  0xd9   : > { %4077 = vmatprep.mubr.msk.f32.mxu1 %vm354_vm2, %v4963_v45 }
  0xdb   : > { %4128 = vmatmul.mubr.msk.f32.gmra.mxu0 %vm354_vm2, %v4489_v20 }
  0xdc   : > { %4078 = vmatmul.mubr.msk.f32.gmra.mxu1 %vm354_vm2, %v6243_v55  ;;  %4130 = vmatprep.mubr.msk.f32.mxu0 %vm354_vm2, %v4530_v35 }
  0xdd   : > { %4080 = vmatprep.mubr.msk.f32.mxu1 %vm354_vm2, %v4980_v26 }
  0xdf   : > { %v5335_v5 = vpop.f32.mrf.mxu0  ;;  %4131 = vmatmul.mubr.msk.f32.gmra.mxu0 %vm354_vm2, %v4541_v39 }
  0xe0   : > { %v5339_v8 = vpop.f32.mrf.mxu1  ;;  %4081 = vmatmul.mubr.msk.f32.gmra.mxu1 %vm354_vm2, %v6244_v19  ;;  %4133 = vmatprep.mubr.msk.f32.mxu0 %vm354_vm2, %v4578_v53 }
  0xe1   : > { %v5345_v20 = vpop.f32.mrf.mxu0  ;;  %4083 = vmatprep.mubr.msk.f32.mxu1 %vm354_vm2, %v4997_v42 }
  0xe2   : > { %v5349_v35 = vpop.f32.mrf.mxu1 }
  0xe3   : > { %v5351_v61 = vpop.f32.mrf.mxu0  ;;  %4134 = vmatmul.mubr.msk.f32.gmra.mxu0 %vm354_vm2, %v4581_v54 }
  0xe4   : > { %v5355_v39 = vpop.f32.mrf.mxu1  ;;  %4084 = vmatmul.mubr.msk.f32.gmra.mxu1 %vm354_vm2, %v6245_v25  ;;  %4136 = vmatprep.mubr.msk.f32.mxu0 %vm354_vm2, %v4617_v2 }
  0xe5   : > { %v5361_v53 = vpop.f32.mrf.mxu0  ;;  %4086 = vmatprep.mubr.msk.f32.mxu1 %vm354_vm2, %v6246_v30 }
  0xe6   : > { %v5365_v59 = vpop.f32.mrf.mxu1 }
  0xe7   : > { %v5367_v1 = vpop.f32.mrf.mxu0  ;;  %4137 = vmatmul.mubr.msk.f32.gmra.mxu0 %vm354_vm2, %v4620_v6 }
  0xe8   : > { %v5371_v54 = vpop.f32.mrf.mxu1  ;;  %4087 = vmatmul.mubr.msk.f32.gmra.mxu1 %vm354_vm2, %v6247_v24  ;;  %4139 = vmatprep.mubr.msk.f32.mxu0 %vm354_vm2, %v4652_v31 }
  0xe9   : > { %v5377_v2 = vpop.f32.mrf.mxu0  ;;  %4089 = vmatprep.mubr.msk.f32.mxu1 %vm354_vm2, %v6248_v40 }
  0xea   : > { %v5381_v7 = vpop.f32.mrf.mxu1 }
  0xeb   : > { %v5383_v44 = vpop.f32.mrf.mxu0  ;;  %4140 = vmatmul.mubr.msk.f32.gmra.mxu0 %vm354_vm2, %v4655_v32 }
  0xec   : > { %v5387_v6 = vpop.f32.mrf.mxu1  ;;  %4090 = vmatmul.mubr.msk.f32.gmra.mxu1 %vm354_vm2, %v6249_v22  ;;  %4142 = vmatprep.mubr.msk.f32.mxu0 %vm354_vm2, %v4696_v11 }
  0xed   : > { %v5393_v31 = vpop.f32.mrf.mxu0  ;;  %4092 = vmatprep.mubr.msk.f32.mxu1 %vm354_vm2, %v5048_v38 }
  0xee   : > { %v5397_v18 = vpop.f32.mrf.mxu1 }
  0xef   : > { %v5399_v3 = vpop.f32.mrf.mxu0  ;;  %4143 = vmatmul.mubr.msk.f32.gmra.mxu0 %vm354_vm2, %v6211_v0  ;;  %v1888_v0 = vrot.slane %v5221_v41, 2 }
  0xf0   : > { %v5403_v32 = vpop.f32.mrf.mxu1  ;;  %4093 = vmatmul.mubr.msk.f32.gmra.mxu1 %vm354_vm2, %v5059_v58  ;;  %4145 = vmatprep.mubr.msk.f32.mxu0 %vm354_vm2, %v4740_v51 }
  0xf1   : > { %6250 = vst [vmem:[#allocation9_spill] sm:$0xff] %v5403_v32  ;;  %v5409_v11 = vpop.f32.mrf.mxu0  ;;  %4095 = vmatprep.mubr.msk.f32.mxu1 %vm354_vm2, %v5065_v56  ;;  %v5451_v32 = vld [vmem:[%s4451_s7 + $0x1a0] sm:$0xff] }
  0xf2   : > { %v5414_v27 = vpop.f32.mrf.mxu1 }
  0xf3   : > { %6251 = vst [vmem:[#allocation11_spill] sm:$0xff] %v5414_v27  ;;  %v5417_v62 = vpop.f32.mrf.mxu0  ;;  %4146 = vmatmul.mubr.msk.f32.gmra.mxu0 %vm354_vm2, %v6212_v16  ;;  %v1890_v27 = vrot.slane %v5234_v52, 2  ;;  %v5438_v16 = vsel %vm940_vm3, %v1887_v57, %v1888_v0 }
  0xf4   : > { %v5421_v50 = vpop.f32.mrf.mxu1  ;;  %4096 = vmatmul.mubr.msk.f32.gmra.mxu1 %vm354_vm2, %v5076_v63  ;;  %4148 = vmatprep.mubr.msk.f32.mxu0 %vm354_vm2, %v5218_v29  ;;  %6254 = vst [vmem:[#allocation17_spill] sm:$0xff] %v5438_v16 }
  0xf5   : > { %6252 = vst [vmem:[#allocation13_spill] sm:$0xff] %v5421_v50  ;;  %v5427_v51 = vpop.f32.mrf.mxu0  ;;  %4098 = vmatprep.mubr.msk.f32.mxu1 %vm354_vm2, %v5082_v13  ;;  %v5458_v57 = vsel %vm940_vm3, %v1888_v0, %v1890_v27 }
  0xf6   : > { %v5435_v43 = vpop.f32.mrf.mxu1  ;;  %6256 = vst [vmem:[#allocation37_spill] sm:$0xff] %v5458_v57 }
  0xf7   : > { %6253 = vst [vmem:[#allocation15_spill] sm:$0xff] %v5435_v43  ;;  %v5440_v50 = vpop.f32.mrf.mxu0  ;;  %4149 = vmatmul.mubr.msk.f32.gmra.mxu0 %vm354_vm2, %v5221_v41 }
  0xf8   : > { %v5444_v29 = vpop.f32.mrf.mxu1  ;;  %4099 = vmatmul.mubr.msk.f32.gmra.mxu1 %vm354_vm2, %v5091_v15  ;;  %4151 = vmatprep.mubr.msk.f32.mxu0 %vm354_vm2, %v5432_v36 }
  0xf9   : > { %6255 = vst [vmem:[#allocation22_spill] sm:$0xff] %v5444_v29  ;;  %v5453_v52 = vpop.f32.mrf.mxu0  ;;  %4101 = vmatprep.mubr.msk.f32.mxu1 %vm354_vm2, %v5438_v16 }
  0xfa   : > { %v5460_v43 = vpop.f32.mrf.mxu1 }
  0xfb   : > { %6257 = vst [vmem:[#allocation38_spill] sm:$0xff] %v5460_v43  ;;  %v5462_v41 = vpop.f32.mrf.mxu0  ;;  %4152 = vmatmul.mubr.msk.f32.gmra.mxu0 %vm354_vm2, %v5451_v32 }
  0xfc   : > { %v5466_v29 = vpop.f32.mrf.mxu1  ;;  %4102 = vmatmul.mubr.msk.f32.gmra.mxu1 %vm354_vm2, %v5458_v57  ;;  %4206 = vmatprep.mubr.msk.f32.mxu0 %vm354_vm2, %v4855_v4 }
  0xfd   : > { %6258 = vst [vmem:[#allocation39_spill] sm:$0xff] %v5466_v29  ;;  %v5472_v15 = vpop.f32.mrf.mxu0  ;;  %4156 = vmatprep.mubr.msk.f32.mxu1 %vm354_vm2, %v6216_v14 }
  0xfe   : > { %v5476_v27 = vpop.f32.mrf.mxu1 }
  0xff   : > { %6259 = vst [vmem:[#allocation40_spill] sm:$0xff] %v5476_v27  ;;  %v3908_v0 = vpop.f32.mrf.mxu0  ;;  %4207 = vmatmul.mubr.msk.f32.vlgmr.msra.gmra.mxu0 %vm354_vm2, %v4872_v21 }
 0x100   : > { %v3858_v43 = vpop.f32.mrf.mxu1  ;;  %4157 = vmatmul.mubr.msk.f32.vlgmr.msra.gmra.mxu1 %vm354_vm2, %v6217_v17  ;;  %4209 = vmatprep.mubr.msk.f32.mxu0 %vm354_vm2, %v4878_v10 }
 0x101   : > { %v787_v4 = vadd.f32 %v3858_v43, %v5335_v5  ;;  %v1156_v29 = vpop.f32.mrf.mxu0  ;;  %4159 = vmatprep.mubr.msk.f32.mxu1 %vm354_vm2, %v6218_v23  ;;  %v6260_v23 = vld [vmem:[#allocation19_spill] sm:$0xff] }
 0x102   : > { %v781_v14 = vpop.f32.mrf.mxu1 }
 0x103   : > { %v5487_v57 = vadd.f32 %v3908_v0, %v787_v4  ;;  %v782_v27 = vadd.f32 %v781_v14, %v5345_v20  ;;  %v3911_v16 = vpop.f32.mrf.mxu0  ;;  %4210 = vmatmul.mubr.msk.f32.gmra.mxu0 %vm354_vm2, %v4889_v60  ;;  %v6262_v14 = vld [vmem:[#allocation27_spill] sm:$0xff] }
 0x104   : > { %v3861_v21 = vpop.f32.mrf.mxu1  ;;  %4160 = vmatmul.mubr.msk.f32.gmra.mxu1 %vm354_vm2, %v6219_v9  ;;  %4212 = vmatprep.mubr.msk.f32.mxu0 %vm354_vm2, %v4895_v49 }
 0x105   : > { %v5496_v43 = vadd.f32 %v1156_v29, %v782_v27  ;;  %v797_v10 = vadd.f32 %v3861_v21, %v5351_v61  ;;  %v1166_v17 = vpop.f32.mrf.mxu0  ;;  %4162 = vmatprep.mubr.msk.f32.mxu1 %vm354_vm2, %v6260_v23 }
 0x106   : > { %v791_v5 = vpop.f32.mrf.mxu1 }
 0x107   : > { %v5501_v20 = vadd.f32 %v3911_v16, %v797_v10  ;;  %v792_v60 = vadd.f32 %v791_v5, %v5361_v53  ;;  %v3914_v0 = vpop.f32.mrf.mxu0  ;;  %4213 = vmatmul.mubr.msk.f32.gmra.mxu0 %vm354_vm2, %v6239_v33  ;;  %v6261_v16 = vld [vmem:[#allocation24_spill] sm:$0xff]  ;;  %v6263_v10 = vld [vmem:[#allocation29_spill] sm:$0xff] }
 0x108   : > { %v3864_v9 = vpop.f32.mrf.mxu1  ;;  %4163 = vmatmul.mubr.msk.f32.gmra.mxu1 %vm354_vm2, %v6221_v46  ;;  %4215 = vmatprep.mubr.msk.f32.mxu0 %vm354_vm2, %v4912_v12 }
 0x109   : > { %v5510_v49 = vadd.f32 %v1166_v17, %v792_v60  ;;  %v807_v61 = vadd.f32 %v3864_v9, %v5367_v1  ;;  %v1176_v29 = vpop.f32.mrf.mxu0  ;;  %4165 = vmatprep.mubr.msk.f32.mxu1 %vm354_vm2, %v6261_v16  ;;  %v6264_v60 = vld [vmem:[#allocation31_spill] sm:$0xff]  ;;  %v6265_v9 = vld [vmem:[#allocation33_spill] sm:$0xff] }
 0x10a   : > { %v801_v53 = vpop.f32.mrf.mxu1 }
 0x10b   : > { %v5515_v27 = vadd.f32 %v3914_v0, %v807_v61  ;;  %v802_v33 = vadd.f32 %v801_v53, %v5377_v2  ;;  %v3917_v4 = vpop.f32.mrf.mxu0  ;;  %4216 = vmatmul.mubr.msk.f32.gmra.mxu0 %vm354_vm2, %v6240_v34  ;;  %v6266_v53 = vld [vmem:[#allocation35_spill] sm:$0xff] }
 0x10c   : > { %v3867_v46 = vpop.f32.mrf.mxu1  ;;  %4166 = vmatmul.mubr.msk.f32.gmra.mxu1 %vm354_vm2, %v6262_v14  ;;  %4218 = vmatprep.mubr.msk.f32.mxu0 %vm354_vm2, %v4929_v37 }
 0x10d   : > { %v5524_v12 = vadd.f32 %v1176_v29, %v802_v33  ;;  %v817_v1 = vadd.f32 %v3867_v46, %v5383_v44  ;;  %v1186_v21 = vpop.f32.mrf.mxu0  ;;  %4168 = vmatprep.mubr.msk.f32.mxu1 %vm354_vm2, %v6263_v10 }
 0x10e   : > { %v811_v2 = vpop.f32.mrf.mxu1 }
 0x10f   : > { %v5529_v17 = vadd.f32 %v3917_v4, %v817_v1  ;;  %v812_v34 = vadd.f32 %v811_v2, %v5393_v31  ;;  %v3920_v23 = vpop.f32.mrf.mxu0  ;;  %4219 = vmatmul.mubr.msk.f32.gmra.mxu0 %vm354_vm2, %v6241_v47  ;;  %v6267_v4 = vld [vmem:[#allocation5_spill] sm:$0xff]  ;;  %v6269_v2 = vld [vmem:[#allocation8_spill] sm:$0xff] }
 0x110   : > { %v3870_v5 = vpop.f32.mrf.mxu1  ;;  %4169 = vmatmul.mubr.msk.f32.gmra.mxu1 %vm354_vm2, %v6264_v60  ;;  %4221 = vmatprep.mubr.msk.f32.mxu0 %vm354_vm2, %v4946_v28  ;;  %v6270_v60 = vld [vmem:[#allocation10_spill] sm:$0xff] }
 0x111   : > { %v5538_v37 = vadd.f32 %v1186_v21, %v812_v34  ;;  %v827_v44 = vadd.f32 %v3870_v5, %v5399_v3  ;;  %v1196_v0 = vpop.f32.mrf.mxu0  ;;  %4171 = vmatprep.mubr.msk.f32.mxu1 %vm354_vm2, %v6265_v9  ;;  %v6268_v21 = vld [vmem:[#allocation6_spill] sm:$0xff] }
 0x112   : > { %v821_v31 = vpop.f32.mrf.mxu1 }
 0x113   : > { %v5543_v61 = vadd.f32 %v3920_v23, %v827_v44  ;;  %v822_v47 = vadd.f32 %v821_v31, %v5409_v11  ;;  %v3923_v29 = vpop.f32.mrf.mxu0  ;;  %4222 = vmatmul.mubr.msk.f32.gmra.mxu0 %vm354_vm2, %v6242_v48 }
 0x114   : > { %v3873_v16 = vpop.f32.mrf.mxu1  ;;  %4172 = vmatmul.mubr.msk.f32.gmra.mxu1 %vm354_vm2, %v6266_v53  ;;  %4224 = vmatprep.mubr.msk.f32.mxu0 %vm354_vm2, %v4963_v45  ;;  %v6273_v53 = vld [vmem:[#allocation16_spill] sm:$0xff] }
 0x115   : > { %v5552_v28 = vadd.f32 %v1196_v0, %v822_v47  ;;  %v837_v3 = vadd.f32 %v3873_v16, %v5417_v62  ;;  %v1206_v33 = vpop.f32.mrf.mxu0  ;;  %4174 = vmatprep.mubr.msk.f32.mxu1 %vm354_vm2, %v6267_v4  ;;  %v6271_v0 = vld [vmem:[#allocation12_spill] sm:$0xff] }
 0x116   : > { %v831_v11 = vpop.f32.mrf.mxu1 }
 0x117   : > { %v5557_v46 = vadd.f32 %v3923_v29, %v837_v3  ;;  %v832_v48 = vadd.f32 %v831_v11, %v5427_v51  ;;  %v3926_v14 = vpop.f32.mrf.mxu0  ;;  %4225 = vmatmul.mubr.msk.f32.gmra.mxu0 %vm354_vm2, %v6243_v55  ;;  %v6272_v29 = vld [vmem:[#allocation14_spill] sm:$0xff] }
 0x118   : > { %v3876_v1 = vpop.f32.mrf.mxu1  ;;  %4175 = vmatmul.mubr.msk.f32.gmra.mxu1 %vm354_vm2, %v6268_v21  ;;  %4227 = vmatprep.mubr.msk.f32.mxu0 %vm354_vm2, %v4980_v26  ;;  %v6274_v11 = vld [vmem:[#allocation18_spill] sm:$0xff] }
 0x119   : > { %v5566_v62 = vadd.f32 %v1206_v33, %v832_v48  ;;  %v847_v45 = vadd.f32 %v3876_v1, %v5440_v50  ;;  %v1216_v10 = vpop.f32.mrf.mxu0  ;;  %4177 = vmatprep.mubr.msk.f32.mxu1 %vm354_vm2, %v6269_v2 }
 0x11a   : > { %v841_v51 = vpop.f32.mrf.mxu1 }
 0x11b   : > { %v5571_v34 = vadd.f32 %v3926_v14, %v847_v45  ;;  %v842_v55 = vadd.f32 %v841_v51, %v5453_v52  ;;  %v3929_v23 = vpop.f32.mrf.mxu0  ;;  %4228 = vmatmul.mubr.msk.f32.gmra.mxu0 %vm354_vm2, %v6244_v19  ;;  %v6275_v14 = vld [vmem:[#allocation20_spill] sm:$0xff]  ;;  %v6277_v51 = vld [vmem:[#allocation25_spill] sm:$0xff] }
 0x11c   : > { %v3879_v5 = vpop.f32.mrf.mxu1  ;;  %4178 = vmatmul.mubr.msk.f32.gmra.mxu1 %vm354_vm2, %v6270_v60  ;;  %4230 = vmatprep.mubr.msk.f32.mxu0 %vm354_vm2, %v4997_v42  ;;  %v6278_v60 = vld [vmem:[#allocation28_spill] sm:$0xff] }
 0x11d   : > { %v5580_v26 = vadd.f32 %v1216_v10, %v842_v55  ;;  %v857_v50 = vadd.f32 %v3879_v5, %v5462_v41  ;;  %v1226_v44 = vpop.f32.mrf.mxu0  ;;  %4180 = vmatprep.mubr.msk.f32.mxu1 %vm354_vm2, %v6271_v0  ;;  %v6276_v10 = vld [vmem:[#allocation23_spill] sm:$0xff] }
 0x11e   : > { %v851_v52 = vpop.f32.mrf.mxu1 }
 0x11f   : > { %v5585_v9 = vadd.f32 %v3929_v23, %v857_v50  ;;  %v852_v19 = vadd.f32 %v851_v52, %v5472_v15  ;;  %v3932_v31 = vpop.f32.mrf.mxu0  ;;  %4231 = vmatmul.mubr.msk.f32.gmra.mxu0 %vm354_vm2, %v6245_v25 }
 0x120   : > { %v3882_v47 = vpop.f32.mrf.mxu1  ;;  %4181 = vmatmul.mubr.msk.f32.gmra.mxu1 %vm354_vm2, %v6272_v29  ;;  %4233 = vmatprep.mubr.msk.f32.mxu0 %vm354_vm2, %v6246_v30  ;;  %v6281_v29 = vld [vmem:[#allocation9_spill] sm:$0xff] }
 0x121   : > { %v5594_v42 = vadd.f32 %v1226_v44, %v852_v19  ;;  %v867_v41 = vadd.f32 %v3882_v47, %v5339_v8  ;;  %v1236_v16 = vpop.f32.mrf.mxu0  ;;  %4183 = vmatprep.mubr.msk.f32.mxu1 %vm354_vm2, %v6273_v53  ;;  %v6279_v44 = vld [vmem:[#allocation30_spill] sm:$0xff]  ;;  %v2427_v53 = vrot.slane %v5432_v36, 1 }
 0x122   : > { %v861_v15 = vpop.f32.mrf.mxu1 }
 0x123   : > { %v5599_v3 = vadd.f32 %v3932_v31, %v867_v41  ;;  %v862_v25 = vadd.f32 %v861_v15, %v5349_v35  ;;  %v3935_v33 = vpop.f32.mrf.mxu0  ;;  %4234 = vmatmul.mubr.msk.f32.gmra.mxu0 %vm354_vm2, %v6247_v24  ;;  %v2699_v31 = vrot.slane %v5451_v32, 2  ;;  %v2428_v15 = vrot.slane %v5451_v32, 1  ;;  %v6287_v32 = vld [vmem:[#allocation13_spill] sm:$0xff] }
 0x124   : > { %v3885_v4 = vpop.f32.mrf.mxu1  ;;  %4184 = vmatmul.mubr.msk.f32.gmra.mxu1 %vm354_vm2, %v6274_v11  ;;  %4236 = vmatprep.mubr.msk.f32.mxu0 %vm354_vm2, %v6248_v40 }
 0x125   : > { %v5608_v8 = vadd.f32 %v1236_v16, %v862_v25  ;;  %v877_v30 = vadd.f32 %v3885_v4, %v5355_v39  ;;  %v1246_v48 = vpop.f32.mrf.mxu0  ;;  %4186 = vmatprep.mubr.msk.f32.mxu1 %vm354_vm2, %v6275_v14  ;;  %v6282_v16 = vld [vmem:[#allocation34_spill] sm:$0xff]  ;;  %v6285_v14 = vld [vmem:[#allocation36_spill] sm:$0xff] }
 0x126   : > { %v871_v35 = vpop.f32.mrf.mxu1 }
 0x127   : > { %v5613_v1 = vadd.f32 %v3935_v33, %v877_v30  ;;  %v872_v24 = vadd.f32 %v871_v35, %v5365_v59  ;;  %v3938_v21 = vpop.f32.mrf.mxu0  ;;  %4237 = vmatmul.mubr.msk.f32.gmra.mxu0 %vm354_vm2, %v6249_v22  ;;  %v6284_v30 = vld [vmem:[#allocation21_spill] sm:$0xff] }
 0x128   : > { %v3888_v45 = vpop.f32.mrf.mxu1  ;;  %4187 = vmatmul.mubr.msk.f32.gmra.mxu1 %vm354_vm2, %v6276_v10  ;;  %4239 = vmatprep.mubr.msk.f32.mxu0 %vm354_vm2, %v5048_v38  ;;  %v6286_v35 = vld [vmem:[#allocation17_spill] sm:$0xff]  ;;  %v6288_v10 = vld [vmem:[#allocation26_spill] sm:$0xff] }
 0x129   : > { %v5622_v39 = vadd.f32 %v1246_v48, %v872_v24  ;;  %v887_v40 = vadd.f32 %v3888_v45, %v5371_v54  ;;  %v1256_v2 = vpop.f32.mrf.mxu0  ;;  %4189 = vmatprep.mubr.msk.f32.mxu1 %vm354_vm2, %v6277_v51 }
 0x12a   : > { %v881_v59 = vpop.f32.mrf.mxu1 }
 0x12b   : > { %v5627_v55 = vadd.f32 %v3938_v21, %v887_v40  ;;  %v882_v22 = vadd.f32 %v881_v59, %v5381_v7  ;;  %v3941_v23 = vpop.f32.mrf.mxu0  ;;  %4240 = vmatmul.mubr.msk.f32.gmra.mxu0 %vm354_vm2, %v5059_v58  ;;  %v2429_v59 = vsel %vm271_vm1, %v2427_v53, %v2428_v15 }
 0x12c   : > { %v3891_v5 = vpop.f32.mrf.mxu1  ;;  %4190 = vmatmul.mubr.msk.f32.gmra.mxu1 %vm354_vm2, %v6278_v60  ;;  %4242 = vmatprep.mubr.msk.f32.mxu0 %vm354_vm2, %v5065_v56  ;;  %v6280_v56 = vld [vmem:[#allocation32_spill] sm:$0xff] }
 0x12d   : > { %v5636_v38 = vadd.f32 %v1256_v2, %v882_v22  ;;  %v897_v54 = vadd.f32 %v3891_v5, %v5387_v6  ;;  %v1266_v50 = vpop.f32.mrf.mxu0  ;;  %4192 = vmatprep.mubr.msk.f32.mxu1 %vm354_vm2, %v6279_v44  ;;  %v2698_v6 = vrot.slane %v5432_v36, 2  ;;  %v6291_v44 = vld [vmem:[#allocation7_spill] sm:$0xff] }
 0x12e   : > { %v891_v7 = vpop.f32.mrf.mxu1 }
 0x12f   : > { %v5641_v0 = vadd.f32 %v3941_v23, %v897_v54  ;;  %v892_v58 = vadd.f32 %v891_v7, %v5397_v18  ;;  %v3944_v52 = vpop.f32.mrf.mxu0  ;;  %4243 = vmatmul.mubr.msk.f32.gmra.mxu0 %vm354_vm2, %v5076_v63  ;;  %v221_v63 = vld [vmem:[%s4451_s7 + $0x1a8] sm:$0x3]  ;;  %v2700_v40 = vsel %vm940_vm3, %v2698_v6, %v2699_v31  ;;  %v6289_v23 = vld [vmem:[#allocation15_spill] sm:$0xff]  ;;  %s3138_s7 = sshll.u32 %s162_s6, 4  ;;  %s3139_s7 = int_to_ptr.vmem [resolvable:$true] %s3138_s7 }
 0x130   : > { %v3894_v19 = vpop.f32.mrf.mxu1  ;;  %4193 = vmatmul.mubr.msk.f32.gmra.mxu1 %vm354_vm2, %v6280_v56  ;;  %4245 = vmatprep.mubr.msk.f32.mxu0 %vm354_vm2, %v5082_v13  ;;  %v6283_v13 = vld [vmem:[#allocation11_spill] sm:$0xff]  ;;  %v2701_v24 = vrot.slane %v221_v63, 2  ;;  %v2430_v2 = vrot.slane %v221_v63, 1  ;;  %v6290_v54 = vld [vmem:[#allocation37_spill] sm:$0xff]  ;;  %s4300_s17 = scalar_lea.vmem %s3139_s7, 16  ;;  %p4307_p0 = scmp.lt.s32.totalorder %s3139_s7, %s4305_s20 }
 0x131   : > { %v5652_v47 = vadd.f32 %v1266_v50, %v892_v58  ;;  %v907_v41 = vadd.f32 %v3894_v19, %v6281_v29  ;;  %v1276_v18 = vpop.f32.mrf.mxu0  ;;  %4195 = vmatprep.mubr.msk.f32.mxu1 %vm354_vm2, %v6282_v16  ;;  %p4301_p11 = scmp.ne.s32.totalorder %s3139_s7, %s4300_s17  ;;  %p4308_p1 = scmp.lt.s32.totalorder %s4306_s16, %s4300_s17 }
 0x132   : > { %v901_v25 = vpop.f32.mrf.mxu1  ;;  %v2702_v7 = vsel %vm940_vm3, %v2699_v31, %v2701_v24  ;;  %v2431_v6 = vsel %vm271_vm1, %v2428_v15, %v2430_v2  ;;  %v6295_v15 = vld [vmem:[#allocation40_spill] sm:$0xff] }
 0x133   : > { %v5660_v33 = vadd.f32 %v3944_v52, %v907_v41  ;;  %v902_v4 = vadd.f32 %v901_v25, %v6283_v13  ;;  %v3947_v11 = vpop.f32.mrf.mxu0  ;;  %4246 = vmatmul.mubr.msk.f32.gmra.mxu0 %vm354_vm2, %v6284_v30  ;;  %v6292_v52 = vld [vmem:[#allocation22_spill] sm:$0xff]  ;;  %v6294_v25 = vld [vmem:[#allocation39_spill] sm:$0xff]  ;;  %p4302_p12 = pnand %p4301_p11, %p4421_p5  ;;  %p4309_p2 = por %p4308_p1, %p4307_p0 }
 0x134   : > { %v3897_v48 = vpop.f32.mrf.mxu1  ;;  %4196 = vmatmul.mubr.msk.f32.gmra.mxu1 %vm354_vm2, %v6285_v14  ;;  %4248 = vmatprep.mubr.msk.f32.mxu0 %vm354_vm2, %v6286_v35 }
 0x135   : > { %v5669_v36 = vadd.f32 %v1276_v18, %v902_v4  ;;  %v917_v21 = vadd.f32 %v3897_v48, %v6287_v32  ;;  %v1286_v45 = vpop.f32.mrf.mxu0  ;;  %4198 = vmatprep.mubr.msk.f32.mxu1 %vm354_vm2, %v6288_v10  ;;  %v6293_v18 = vld [vmem:[#allocation38_spill] sm:$0xff]  ;;  %p4303_p13 = pneg %p4302_p12 }
 0x136   : > { %v911_v51 = vpop.f32.mrf.mxu1 }
 0x137   : > { %v5676_v22 = vadd.f32 %v3947_v11, %v917_v21  ;;  %v912_v5 = vadd.f32 %v911_v51, %v6289_v23  ;;  %v3950_v60 = vpop.f32.mrf.mxu0  ;;  %4249 = vmatmul.mubr.msk.f32.gmra.mxu0 %vm354_vm2, %v6290_v54  ;;  %p4310_p3 = pnand %p4309_p2, %p4303_p13 }
 0x138   : > { %v3900_v50 = vpop.f32.mrf.mxu1  ;;  %4199 = vmatmul.mubr.msk.f32.gmra.mxu1 %vm354_vm2, %v6291_v44  ;;  %4251 = vmatprep.mubr.msk.f32.mxu0 %vm354_vm2, %v2700_v40 }
 0x139   : > { %v5685_v58 = vadd.f32 %v1286_v45, %v912_v5  ;;  %v927_v19 = vadd.f32 %v3900_v50, %v6292_v52  ;;  %v1296_v56 = vpop.f32.mrf.mxu0  ;;  %4201 = vmatprep.mubr.msk.f32.mxu1 %vm354_vm2, %v2429_v59 }
 0x13a   : > { %v921_v29 = vpop.f32.mrf.mxu1 }
 0x13b   : > { %v5690_v41 = vadd.f32 %v3950_v60, %v927_v19  ;;  %v922_v16 = vadd.f32 %v921_v29, %v6293_v18  ;;  %v3953_v63 = vpop.f32.mrf.mxu0  ;;  %4252 = vmatmul.mubr.msk.f32.gmra.mxu0 %vm354_vm2, %v2702_v7 }
 0x13c   : > { %v3903_v53 = vpop.f32.mrf.mxu1  ;;  %4202 = vmatmul.mubr.msk.f32.gmra.mxu1 %vm354_vm2, %v2431_v6 }
 0x13d   : > { %v5695_v31 = vadd.f32 %v1296_v56, %v922_v16  ;;  %v937_v13 = vadd.f32 %v3903_v53, %v6294_v25  ;;  %v1306_v4 = vpop.f32.mrf.mxu0 }
 0x13e   : > { %v931_v11 = vpop.f32.mrf.mxu1 }
 0x13f   : > { %v5698_v30 = vadd.f32 %v3953_v63, %v937_v13  ;;  %v932_v48 = vadd.f32 %v931_v11, %v6295_v15  ;;  %v4008_v14 = vpop.f32.mrf.mxu0 }
 0x140   : > { %v3958_v35 = vpop.f32.mrf.mxu1 }
 0x141   : > { %v5701_v24 = vadd.f32 %v1306_v4, %v932_v48  ;;  %v1584_v32 = vadd.f32 %v3958_v35, %v5487_v57  ;;  %v1696_v21 = vpop.f32.mrf.mxu0 }
 0x142   : > { %v1424_v45 = vpop.f32.mrf.mxu1 }
 0x143   : > { %v5704_v10 = vadd.f32 %v4008_v14, %v1584_v32  ;;  %v1583_v40 = vadd.f32 %v1424_v45, %v5496_v43  ;;  %v4011_v2 = vpop.f32.mrf.mxu0 }
 0x144   : > { %v3961_v51 = vpop.f32.mrf.mxu1 }
 0x145   : > { %v5707_v59 = vadd.f32 %v1696_v21, %v1583_v40  ;;  %v1586_v23 = vadd.f32 %v3961_v51, %v5501_v20  ;;  %v1706_v5 = vpop.f32.mrf.mxu0 }
 0x146   : > { %v1434_v60 = vpop.f32.mrf.mxu1 }
 0x147   : > { %v5710_v54 = vadd.f32 %v4011_v2, %v1586_v23  ;;  %v1585_v50 = vadd.f32 %v1434_v60, %v5510_v49  ;;  %v4014_v44 = vpop.f32.mrf.mxu0 }
 0x148   : > { %v3964_v57 = vpop.f32.mrf.mxu1 }
 0x149   : > { %v5713_v7 = vadd.f32 %v1706_v5, %v1585_v50  ;;  %v1588_v52 = vadd.f32 %v3964_v57, %v5515_v27  ;;  %v1716_v19 = vpop.f32.mrf.mxu0 }
 0x14a   : > { %v1444_v43 = vpop.f32.mrf.mxu1 }
 0x14b   : > { %v5716_v56 = vadd.f32 %v4014_v44, %v1588_v52  ;;  %v1587_v6 = vadd.f32 %v1444_v43, %v5524_v12  ;;  %v4017_v29 = vpop.f32.mrf.mxu0 }
 0x14c   : > { %v3967_v20 = vpop.f32.mrf.mxu1 }
 0x14d   : > { %v5719_v18 = vadd.f32 %v1716_v19, %v1587_v6  ;;  %v1590_v16 = vadd.f32 %v3967_v20, %v5529_v17  ;;  %v1726_v63 = vpop.f32.mrf.mxu0 }
 0x14e   : > { %v1454_v49 = vpop.f32.mrf.mxu1 }
 0x14f   : > { %v5722_v53 = vadd.f32 %v4017_v29, %v1590_v16  ;;  %v1589_v25 = vadd.f32 %v1454_v49, %v5538_v37  ;;  %v4020_v13 = vpop.f32.mrf.mxu0 }
 0x150   : > { %v3970_v27 = vpop.f32.mrf.mxu1 }
 0x151   : > { %v5725_v4 = vadd.f32 %v1726_v63, %v1589_v25  ;;  %v1592_v11 = vadd.f32 %v3970_v27, %v5543_v61  ;;  %v1736_v15 = vpop.f32.mrf.mxu0 }
 0x152   : > { %v1464_v12 = vpop.f32.mrf.mxu1 }
 0x153   : > { %v5728_v48 = vadd.f32 %v4020_v13, %v1592_v11  ;;  %v1591_v14 = vadd.f32 %v1464_v12, %v5552_v28  ;;  %v4023_v35 = vpop.f32.mrf.mxu0 }
 0x154   : > { %v3973_v17 = vpop.f32.mrf.mxu1 }
 0x155   : > { %v5731_v32 = vadd.f32 %v1736_v15, %v1591_v14  ;;  %v1594_v21 = vadd.f32 %v3973_v17, %v5557_v46  ;;  %v1746_v45 = vpop.f32.mrf.mxu0 }
 0x156   : > { %v1474_v37 = vpop.f32.mrf.mxu1 }
 0x157   : > { %v5734_v40 = vadd.f32 %v4023_v35, %v1594_v21  ;;  %v1593_v2 = vadd.f32 %v1474_v37, %v5566_v62  ;;  %v4026_v51 = vpop.f32.mrf.mxu0 }
 0x158   : > { %v3976_v61 = vpop.f32.mrf.mxu1 }
 0x159   : > { %v5737_v23 = vadd.f32 %v1746_v45, %v1593_v2  ;;  %v1596_v5 = vadd.f32 %v3976_v61, %v5571_v34  ;;  %v1756_v60 = vpop.f32.mrf.mxu0 }
 0x15a   : > { %v1484_v28 = vpop.f32.mrf.mxu1 }
 0x15b   : > { %v5740_v50 = vadd.f32 %v4026_v51, %v1596_v5  ;;  %v1595_v44 = vadd.f32 %v1484_v28, %v5580_v26  ;;  %v4029_v57 = vpop.f32.mrf.mxu0 }
 0x15c   : > { %v3979_v46 = vpop.f32.mrf.mxu1 }
 0x15d   : > { %v5743_v52 = vadd.f32 %v1756_v60, %v1595_v44  ;;  %v1598_v19 = vadd.f32 %v3979_v46, %v5585_v9  ;;  %v1766_v43 = vpop.f32.mrf.mxu0 }
 0x15e   : > { %v1494_v62 = vpop.f32.mrf.mxu1 }
 0x15f   : > { %v5746_v6 = vadd.f32 %v4029_v57, %v1598_v19  ;;  %v1597_v29 = vadd.f32 %v1494_v62, %v5594_v42  ;;  %v4032_v20 = vpop.f32.mrf.mxu0 }
 0x160   : > { %v3982_v34 = vpop.f32.mrf.mxu1 }
 0x161   : > { %v5749_v16 = vadd.f32 %v1766_v43, %v1597_v29  ;;  %v1600_v63 = vadd.f32 %v3982_v34, %v5599_v3  ;;  %v1776_v49 = vpop.f32.mrf.mxu0 }
 0x162   : > { %v1504_v26 = vpop.f32.mrf.mxu1 }
 0x163   : > { %v5752_v25 = vadd.f32 %v4032_v20, %v1600_v63  ;;  %v1599_v13 = vadd.f32 %v1504_v26, %v5608_v8  ;;  %v4035_v27 = vpop.f32.mrf.mxu0 }
 0x164   : > { %v3985_v9 = vpop.f32.mrf.mxu1 }
 0x165   : > { %v5755_v11 = vadd.f32 %v1776_v49, %v1599_v13  ;;  %v1602_v15 = vadd.f32 %v3985_v9, %v5613_v1  ;;  %v1786_v12 = vpop.f32.mrf.mxu0 }
 0x166   : > { %v1514_v42 = vpop.f32.mrf.mxu1 }
 0x167   : > { %v5758_v14 = vadd.f32 %v4035_v27, %v1602_v15  ;;  %v1601_v35 = vadd.f32 %v1514_v42, %v5622_v39  ;;  %v4038_v17 = vpop.f32.mrf.mxu0 }
 0x168   : > { %v3988_v3 = vpop.f32.mrf.mxu1 }
 0x169   : > { %v5761_v21 = vadd.f32 %v1786_v12, %v1601_v35  ;;  %v1604_v45 = vadd.f32 %v3988_v3, %v5627_v55  ;;  %v1796_v37 = vpop.f32.mrf.mxu0 }
 0x16a   : > { %v1524_v8 = vpop.f32.mrf.mxu1 }
 0x16b   : > { %v5764_v2 = vadd.f32 %v4038_v17, %v1604_v45  ;;  %v1603_v51 = vadd.f32 %v1524_v8, %v5636_v38  ;;  %v4041_v61 = vpop.f32.mrf.mxu0 }
 0x16c   : > { %v3991_v1 = vpop.f32.mrf.mxu1 }
 0x16d   : > { %v5767_v5 = vadd.f32 %v1796_v37, %v1603_v51  ;;  %v1606_v60 = vadd.f32 %v3991_v1, %v5641_v0  ;;  %v1806_v28 = vpop.f32.mrf.mxu0 }
 0x16e   : > { %v1534_v39 = vpop.f32.mrf.mxu1 }
 0x16f   : > { %v5770_v44 = vadd.f32 %v4041_v61, %v1606_v60  ;;  %v1605_v57 = vadd.f32 %v1534_v39, %v5652_v47  ;;  %v4044_v46 = vpop.f32.mrf.mxu0 }
 0x170   : > { %v3994_v55 = vpop.f32.mrf.mxu1 }
 0x171   : > { %v5773_v19 = vadd.f32 %v1806_v28, %v1605_v57  ;;  %v1608_v43 = vadd.f32 %v3994_v55, %v5660_v33  ;;  %v1816_v62 = vpop.f32.mrf.mxu0 }
 0x172   : > { %v1544_v38 = vpop.f32.mrf.mxu1 }
 0x173   : > { %v5776_v29 = vadd.f32 %v4044_v46, %v1608_v43  ;;  %v1607_v20 = vadd.f32 %v1544_v38, %v5669_v36  ;;  %v4047_v34 = vpop.f32.mrf.mxu0 }
 0x174   : > { %v3997_v0 = vpop.f32.mrf.mxu1 }
 0x175   : > { %v5779_v63 = vadd.f32 %v1816_v62, %v1607_v20  ;;  %v1610_v49 = vadd.f32 %v3997_v0, %v5676_v22  ;;  %v1826_v26 = vpop.f32.mrf.mxu0 }
 0x176   : > { %v1554_v47 = vpop.f32.mrf.mxu1 }
 0x177   : > { %6296 = vst [vmem:[#allocation41_spill] sm:$0xff] %v5779_v63  ;;  %v5782_v13 = vadd.f32 %v4047_v34, %v1610_v49  ;;  %v1609_v27 = vadd.f32 %v1554_v47, %v5685_v58  ;;  %v4050_v9 = vpop.f32.mrf.mxu0 }
 0x178   : > { %v4000_v33 = vpop.f32.mrf.mxu1 }
 0x179   : > { %v5785_v15 = vadd.f32 %v1826_v26, %v1609_v27  ;;  %v1612_v12 = vadd.f32 %v4000_v33, %v5690_v41  ;;  %v1836_v42 = vpop.f32.mrf.mxu0 }
 0x17a   : > { %v1564_v36 = vpop.f32.mrf.mxu1 }
 0x17b   : > { %6297 = vst [vmem:[#allocation42_spill] sm:$0xff] %v5785_v15  ;;  %v5788_v35 = vadd.f32 %v4050_v9, %v1612_v12  ;;  %v1611_v17 = vadd.f32 %v1564_v36, %v5695_v31  ;;  %v4053_v3 = vpop.f32.mrf.mxu0 }
 0x17c   : > { %v4003_v22 = vpop.f32.mrf.mxu1 }
 0x17d   : > { %v5791_v45 = vadd.f32 %v1836_v42, %v1611_v17  ;;  %v1614_v37 = vadd.f32 %v4003_v22, %v5698_v30  ;;  %v1846_v8 = vpop.f32.mrf.mxu0 }
 0x17e   : > { %v1574_v58 = vpop.f32.mrf.mxu1 }
 0x17f   : > { %6298 = vst [vmem:[#allocation43_spill] sm:$0xff] %v5791_v45  ;;  %v5794_v51 = vadd.f32 %v4053_v3, %v1614_v37  ;;  %v1613_v61 = vadd.f32 %v1574_v58, %v5701_v24  ;;  %v4108_v1 = vpop.f32.mrf.mxu0 }
 0x180   : > { %v4058_v41 = vpop.f32.mrf.mxu1 }
 0x181   : > { %v5797_v60 = vadd.f32 %v1846_v8, %v1613_v61  ;;  %v2127_v28 = vadd.f32 %v4058_v41, %v5704_v10  ;;  %v5800_v39 = vpop.f32.mrf.mxu0 }
 0x182   : > { %v5802_v31 = vpop.f32.mrf.mxu1 }
 0x183   : > { %6299 = vst [vmem:[#allocation44_spill] sm:$0xff] %v5797_v60  ;;  %v5804_v57 = vadd.f32 %v4108_v1, %v2127_v28  ;;  %v4111_v46 = vpop.f32.mrf.mxu0 }
 0x184   : > { %v4061_v30 = vpop.f32.mrf.mxu1 }
 0x185   : > { %v2129_v55 = vadd.f32 %v4061_v30, %v5710_v54  ;;  %v5807_v43 = vpop.f32.mrf.mxu0 }
 0x186   : > { %v5809_v62 = vpop.f32.mrf.mxu1 }
 0x187   : > { %v5811_v24 = vadd.f32 %v4111_v46, %v2129_v55  ;;  %v4114_v38 = vpop.f32.mrf.mxu0 }
 0x188   : > { %v4064_v20 = vpop.f32.mrf.mxu1 }
 0x189   : > { %v2131_v10 = vadd.f32 %v4064_v20, %v5716_v56  ;;  %v5814_v34 = vpop.f32.mrf.mxu0 }
 0x18a   : > { %v5816_v0 = vpop.f32.mrf.mxu1 }
 0x18b   : > { %v5818_v49 = vadd.f32 %v4114_v38, %v2131_v10  ;;  %v4117_v26 = vpop.f32.mrf.mxu0 }
 0x18c   : > { %v4067_v47 = vpop.f32.mrf.mxu1 }
 0x18d   : > { %v2133_v54 = vadd.f32 %v4067_v47, %v5722_v53  ;;  %v5821_v27 = vpop.f32.mrf.mxu0 }
 0x18e   : > { %v5823_v9 = vpop.f32.mrf.mxu1 }
 0x18f   : > { %v5825_v33 = vadd.f32 %v4117_v26, %v2133_v54  ;;  %v4120_v12 = vpop.f32.mrf.mxu0 }
 0x190   : > { %v4070_v42 = vpop.f32.mrf.mxu1 }
 0x191   : > { %v2135_v56 = vadd.f32 %v4070_v42, %v5728_v48  ;;  %v5828_v36 = vpop.f32.mrf.mxu0 }
 0x192   : > { %v5830_v17 = vpop.f32.mrf.mxu1 }
 0x193   : > { %v5832_v3 = vadd.f32 %v4120_v12, %v2135_v56  ;;  %v4123_v22 = vpop.f32.mrf.mxu0 }
 0x194   : > { %v4073_v37 = vpop.f32.mrf.mxu1 }
 0x195   : > { %v2137_v53 = vadd.f32 %v4073_v37, %v5734_v40  ;;  %v5835_v8 = vpop.f32.mrf.mxu0 }
 0x196   : > { %v5837_v58 = vpop.f32.mrf.mxu1 }
 0x197   : > { %v5839_v61 = vadd.f32 %v4123_v22, %v2137_v53  ;;  %v4126_v1 = vpop.f32.mrf.mxu0 }
 0x198   : > { %v4076_v41 = vpop.f32.mrf.mxu1 }
 0x199   : > { %v2139_v48 = vadd.f32 %v4076_v41, %v5740_v50  ;;  %v5842_v28 = vpop.f32.mrf.mxu0 }
 0x19a   : > { %v5844_v46 = vpop.f32.mrf.mxu1 }
 0x19b   : > { %v5846_v30 = vadd.f32 %v4126_v1, %v2139_v48  ;;  %v4129_v55 = vpop.f32.mrf.mxu0 }
 0x19c   : > { %v4079_v38 = vpop.f32.mrf.mxu1 }
 0x19d   : > { %v2141_v40 = vadd.f32 %v4079_v38, %v5746_v6  ;;  %v5849_v20 = vpop.f32.mrf.mxu0 }
 0x19e   : > { %v5851_v10 = vpop.f32.mrf.mxu1 }
 0x19f   : > { %v5853_v26 = vadd.f32 %v4129_v55, %v2141_v40  ;;  %v4132_v47 = vpop.f32.mrf.mxu0 }
 0x1a0   : > { %v4082_v54 = vpop.f32.mrf.mxu1 }
 0x1a1   : > { %v2143_v50 = vadd.f32 %v4082_v54, %v5752_v25  ;;  %v5856_v12 = vpop.f32.mrf.mxu0 }
 0x1a2   : > { %v5858_v42 = vpop.f32.mrf.mxu1 }
 0x1a3   : > { %v5860_v56 = vadd.f32 %v4132_v47, %v2143_v50  ;;  %v4135_v22 = vpop.f32.mrf.mxu0 }
 0x1a4   : > { %v4085_v37 = vpop.f32.mrf.mxu1 }
 0x1a5   : > { %v2145_v6 = vadd.f32 %v4085_v37, %v5758_v14  ;;  %v5863_v53 = vpop.f32.mrf.mxu0 }
 0x1a6   : > { %v5865_v1 = vpop.f32.mrf.mxu1 }
 0x1a7   : > { %v5867_v41 = vadd.f32 %v4135_v22, %v2145_v6  ;;  %v4138_v48 = vpop.f32.mrf.mxu0 }
 0x1a8   : > { %v4088_v55 = vpop.f32.mrf.mxu1 }
 0x1a9   : > { %v2147_v25 = vadd.f32 %v4088_v55, %v5764_v2  ;;  %v5870_v38 = vpop.f32.mrf.mxu0 }
 0x1aa   : > { %v5872_v40 = vpop.f32.mrf.mxu1 }
 0x1ab   : > { %v5874_v47 = vadd.f32 %v4138_v48, %v2147_v25  ;;  %v4141_v54 = vpop.f32.mrf.mxu0 }
 0x1ac   : > { %v4091_v50 = vpop.f32.mrf.mxu1 }
 0x1ad   : > { %v2149_v14 = vadd.f32 %v4091_v50, %v5770_v44  ;;  %v5877_v37 = vpop.f32.mrf.mxu0 }
 0x1ae   : > { %6300 = vst [vmem:[#allocation45_spill] sm:$0xff] %v5877_v37  ;;  %v5879_v60 = vpop.f32.mrf.mxu1 }
 0x1af   : > { %v5881_v22 = vadd.f32 %v4141_v54, %v2149_v14  ;;  %v4144_v6 = vpop.f32.mrf.mxu0 }
 0x1b0   : > { %v4094_v45 = vpop.f32.mrf.mxu1 }
 0x1b1   : > { %6301 = vst [vmem:[#allocation46_spill] sm:$0xff] %v5881_v22  ;;  %v2151_v2 = vadd.f32 %v4094_v45, %v5776_v29  ;;  %v5884_v55 = vpop.f32.mrf.mxu0 }
 0x1b2   : > { %6302 = vst [vmem:[#allocation47_spill] sm:$0xff] %v5884_v55  ;;  %v5886_v15 = vpop.f32.mrf.mxu1 }
 0x1b3   : > { %v5888_v48 = vadd.f32 %v4144_v6, %v2151_v2  ;;  %v4147_v25 = vpop.f32.mrf.mxu0 }
 0x1b4   : > { %v4097_v63 = vpop.f32.mrf.mxu1 }
 0x1b5   : > { %6303 = vst [vmem:[#allocation19_spill] sm:$0xff] %v5888_v48  ;;  %v2153_v44 = vadd.f32 %v4097_v63, %v5782_v13  ;;  %v5891_v50 = vpop.f32.mrf.mxu0  ;;  %v2126_v63 = vadd.f32 %v5802_v31, %v5707_v59  ;;  %v5920_v59 = vld [vmem:[%s6082_s2] ss:$0 sm:$0xff] }
 0x1b6   : > { %6304 = vst [vmem:[#allocation24_spill] sm:$0xff] %v5891_v50  ;;  %v5893_v37 = vpop.f32.mrf.mxu1 }
 0x1b7   : > { %v5895_v54 = vadd.f32 %v4147_v25, %v2153_v44  ;;  %v4150_v14 = vpop.f32.mrf.mxu0 }
 0x1b8   : > { %v4100_v22 = vpop.f32.mrf.mxu1 }
 0x1b9   : > { %6305 = vst [vmem:[#allocation27_spill] sm:$0xff] %v5895_v54  ;;  %v2155_v29 = vadd.f32 %v4100_v22, %v5788_v35  ;;  %v5898_v45 = vpop.f32.mrf.mxu0 }
 0x1ba   : > { %6306 = vst [vmem:[#allocation29_spill] sm:$0xff] %v5898_v45  ;;  %v5900_v55 = vpop.f32.mrf.mxu1  ;;  %v2394_v45 = vadd.f32 %v5800_v39, %v2126_v63 }
 0x1bb   : > { %v5902_v6 = vadd.f32 %v4150_v14, %v2155_v29  ;;  %v4153_v2 = vpop.f32.mrf.mxu0  ;;  %v2128_v14 = vadd.f32 %v5809_v62, %v5713_v7 }
 0x1bc   : > { %v4103_v48 = vpop.f32.mrf.mxu1 }
 0x1bd   : > { %6307 = vst [vmem:[#allocation31_spill] sm:$0xff] %v5902_v6  ;;  %v2157_v13 = vadd.f32 %v4103_v48, %v5794_v51  ;;  %v5907_v50 = vpop.f32.mrf.mxu0  ;;  %v2396_v39 = vadd.f32 %v5807_v43, %v2128_v14  ;;  %v2132_v43 = vadd.f32 %v5823_v9, %v5725_v4 }
 0x1be   : > { %6308 = vst [vmem:[#allocation33_spill] sm:$0xff] %v5907_v50  ;;  %v5909_v25 = vpop.f32.mrf.mxu1 }
 0x1bf   : > { %6309 = vst [vmem:[#allocation35_spill] sm:$0xff] %v5909_v25  ;;  %v5911_v44 = vadd.f32 %v4153_v2, %v2157_v13  ;;  %v4208_v35 = vpop.f32.mrf.mxu0  ;;  %v2130_v13 = vadd.f32 %v5816_v0, %v5719_v18  ;;  %v2400_v9 = vadd.f32 %v5821_v27, %v2132_v43 }
 0x1c0   : > { %v4158_v22 = vpop.f32.mrf.mxu1 }
 0x1c1   : > { %6310 = vst [vmem:[#allocation5_spill] sm:$0xff] %v5911_v44  ;;  %v2667_v29 = vadd.f32 %v4158_v22, %v5804_v57  ;;  %v2778_v6 = vpop.f32.mrf.mxu0 }
 0x1c2   : > { %v2507_v51 = vpop.f32.mrf.mxu1 }
 0x1c3   : > { %v2938_v31 = vadd.f32 %v4208_v35, %v2667_v29  ;;  %v2666_v48 = vadd.f32 %v2507_v51, %v2394_v45  ;;  %v4211_v2 = vpop.f32.mrf.mxu0  ;;  %v2398_v29 = vadd.f32 %v5814_v34, %v2130_v13 }
 0x1c4   : > { %v4161_v44 = vpop.f32.mrf.mxu1 }
 0x1c5   : > { %v2977_v7 = vadd.f32 %v5920_v59, %v2938_v31  ;;  %v2937_v62 = vadd.f32 %v2778_v6, %v2666_v48  ;;  %v2669_v57 = vadd.f32 %v4161_v44, %v5811_v24  ;;  %v2788_v63 = vpop.f32.mrf.mxu0 }
 0x1c6   : > { %v2517_v22 = vpop.f32.mrf.mxu1 }
 0x1c7   : > { %v3009_v50 = vmax.f32 %v2977_v7, 0.0  ;;  %v2976_v25 = vadd.f32 %v5920_v59, %v2937_v62  ;;  %v2940_v54 = vadd.f32 %v4211_v2, %v2669_v57  ;;  %v2668_v35 = vadd.f32 %v2517_v22, %v2396_v39  ;;  %v4214_v45 = vpop.f32.mrf.mxu0 }
 0x1c8   : > { %v4164_v18 = vpop.f32.mrf.mxu1 }
 0x1c9   : > { %v3008_v0 = vmax.f32 %v2976_v25, 0.0  ;;  %v2979_v6 = vadd.f32 %v5920_v59, %v2940_v54  ;;  %v2939_v14 = vadd.f32 %v2788_v63, %v2668_v35  ;;  %v2798_v24 = vpop.f32.mrf.mxu0  ;;  %v2671_v44 = vadd.f32 %v4164_v18, %v5818_v49 }
 0x1ca   : > { %v2527_v51 = vpop.f32.mrf.mxu1  ;;  %v3042_v31 = vsel %vm3040_vm4, %v3009_v50, 0.0  ;;  %v2134_v50 = vadd.f32 %v5830_v17, %v5731_v32  ;;  %v2136_v63 = vadd.f32 %v5837_v58, %v5737_v23 }
 0x1cb   : > { %v3041_v48 = vsel %vm3040_vm4, %v3008_v0, 0.0  ;;  %v2978_v2 = vadd.f32 %v5920_v59, %v2939_v14  ;;  %v2670_v34 = vadd.f32 %v2527_v51, %v2398_v29  ;;  %v4217_v13 = vpop.f32.mrf.mxu0  ;;  %v3011_v7 = vmax.f32 %v2979_v6, 0.0 }
 0x1cc   : > { %v3043_v39 = vadd.f32 %v3042_v31, %v3041_v48  ;;  %v2942_v62 = vadd.f32 %v4214_v45, %v2671_v44  ;;  %v4167_v4 = vpop.f32.mrf.mxu1  ;;  %v2402_v44 = vadd.f32 %v5828_v36, %v2134_v50  ;;  %v2404_v48 = vadd.f32 %v5835_v8, %v2136_v63 }
 0x1cd   : > { %v3010_v54 = vmax.f32 %v2978_v2, 0.0  ;;  %v2941_v25 = vadd.f32 %v2798_v24, %v2670_v34  ;;  %v2673_v57 = vadd.f32 %v4167_v4, %v5825_v33  ;;  %v2808_v49 = vpop.f32.mrf.mxu0  ;;  %v3046_v0 = vsel %vm3040_vm4, %v3011_v7, 0.0 }
 0x1ce   : > { %v2981_v22 = vadd.f32 %v5920_v59, %v2942_v62  ;;  %v2537_v35 = vpop.f32.mrf.mxu1  ;;  %v2138_v7 = vadd.f32 %v5844_v46, %v5743_v52 }
 0x1cf   : > { %v3044_v29 = vsel %vm3040_vm4, %v3010_v54, 0.0  ;;  %v2980_v45 = vadd.f32 %v5920_v59, %v2941_v25  ;;  %v2944_v18 = vadd.f32 %v4217_v13, %v2673_v57  ;;  %v2672_v27 = vadd.f32 %v2537_v35, %v2400_v9  ;;  %v4220_v43 = vpop.f32.mrf.mxu0 }
 0x1d0   : > { %v3045_v33 = vadd.f32 %v3044_v29, %v3043_v39  ;;  %v3013_v6 = vmax.f32 %v2981_v22, 0.0  ;;  %v4170_v14 = vpop.f32.mrf.mxu1  ;;  %v2406_v46 = vadd.f32 %v5842_v28, %v2138_v7 }
 0x1d1   : > { %v3012_v24 = vmax.f32 %v2980_v45, 0.0  ;;  %v2983_v32 = vadd.f32 %v5920_v59, %v2944_v18  ;;  %v2943_v17 = vadd.f32 %v2808_v49, %v2672_v27  ;;  %v2675_v23 = vadd.f32 %v4170_v14, %v5832_v3  ;;  %v2818_v58 = vpop.f32.mrf.mxu0 }
 0x1d2   : > { %v3047_v51 = vadd.f32 %v3046_v0, %v3045_v33  ;;  %v2547_v31 = vpop.f32.mrf.mxu1  ;;  %v3050_v62 = vsel %vm3040_vm4, %v3013_v6, 0.0  ;;  %v2140_v45 = vadd.f32 %v5851_v10, %v5749_v16 }
 0x1d3   : > { %v3048_v2 = vsel %vm3040_vm4, %v3012_v24, 0.0  ;;  %v2982_v34 = vadd.f32 %v5920_v59, %v2943_v17  ;;  %v2946_v13 = vadd.f32 %v4220_v43, %v2675_v23  ;;  %v4223_v39 = vpop.f32.mrf.mxu0  ;;  %v2674_v3 = vadd.f32 %v2547_v31, %v2402_v44 }
 0x1d4   : > { %v3049_v4 = vadd.f32 %v3048_v2, %v3047_v51  ;;  %v4173_v9 = vpop.f32.mrf.mxu1  ;;  %v3015_v54 = vmax.f32 %v2983_v32, 0.0  ;;  %v2142_v44 = vadd.f32 %v5858_v42, %v5755_v11 }
 0x1d5   : > { %v3014_v36 = vmax.f32 %v2982_v34, 0.0  ;;  %v2985_v25 = vadd.f32 %v5920_v59, %v2946_v13  ;;  %v2677_v8 = vadd.f32 %v4173_v9, %v5839_v61  ;;  %v2828_v57 = vpop.f32.mrf.mxu0  ;;  %v2945_v50 = vadd.f32 %v2818_v58, %v2674_v3 }
 0x1d6   : > { %v3051_v49 = vadd.f32 %v3050_v62, %v3049_v4  ;;  %v2557_v63 = vpop.f32.mrf.mxu1  ;;  %v3054_v61 = vsel %vm3040_vm4, %v3015_v54, 0.0 }
 0x1d7   : > { %v3052_v22 = vsel %vm3040_vm4, %v3014_v36, 0.0  ;;  %v2948_v35 = vadd.f32 %v4223_v39, %v2677_v8  ;;  %v2676_v29 = vadd.f32 %v2557_v63, %v2404_v48  ;;  %v4226_v52 = vpop.f32.mrf.mxu0  ;;  %v2984_v27 = vadd.f32 %v5920_v59, %v2945_v50 }
 0x1d8   : > { %v3053_v18 = vadd.f32 %v3052_v22, %v3051_v49  ;;  %v4176_v43 = vpop.f32.mrf.mxu1  ;;  %v3017_v0 = vmax.f32 %v2985_v25, 0.0  ;;  %v2408_v48 = vadd.f32 %v5849_v20, %v2140_v45  ;;  %v2410_v36 = vadd.f32 %v5856_v12, %v2142_v44 }
 0x1d9   : > { %v2947_v33 = vadd.f32 %v2828_v57, %v2676_v29  ;;  %v2679_v6 = vadd.f32 %v4176_v43, %v5846_v30  ;;  %v2838_v14 = vpop.f32.mrf.mxu0  ;;  %v3016_v24 = vmax.f32 %v2984_v27, 0.0  ;;  %v2987_v17 = vadd.f32 %v5920_v59, %v2948_v35 }
 0x1da   : > { %v3055_v32 = vadd.f32 %v3054_v61, %v3053_v18  ;;  %v2567_v23 = vpop.f32.mrf.mxu1  ;;  %v3058_v30 = vsel %vm3040_vm4, %v3017_v0, 0.0  ;;  %v2144_v57 = vadd.f32 %v5865_v1, %v5761_v21  ;;  %v2146_v21 = vadd.f32 %v5872_v40, %v5767_v5 }
 0x1db   : > { %v2986_v28 = vadd.f32 %v5920_v59, %v2947_v33  ;;  %v2950_v58 = vadd.f32 %v4226_v52, %v2679_v6  ;;  %v2678_v16 = vadd.f32 %v2567_v23, %v2406_v46  ;;  %v4229_v10 = vpop.f32.mrf.mxu0  ;;  %v3056_v51 = vsel %vm3040_vm4, %v3016_v24, 0.0 }
 0x1dc   : > { %v4179_v31 = vpop.f32.mrf.mxu1  ;;  %v3057_v2 = vadd.f32 %v3056_v51, %v3055_v32  ;;  %v3019_v39 = vmax.f32 %v2987_v17, 0.0  ;;  %v2412_v61 = vadd.f32 %v5863_v53, %v2144_v57  ;;  %v2414_v53 = vadd.f32 %v5870_v38, %v2146_v21  ;;  %v6315_v21 = vld [vmem:[#allocation42_spill] sm:$0xff] }
 0x1dd   : > { %v3018_v34 = vmax.f32 %v2986_v28, 0.0  ;;  %v2848_v13 = vpop.f32.mrf.mxu0  ;;  %v2989_v7 = vadd.f32 %v5920_v59, %v2950_v58  ;;  %v2949_v62 = vadd.f32 %v2838_v14, %v2678_v16  ;;  %v2681_v4 = vadd.f32 %v4179_v31, %v5853_v26 }
 0x1de   : > { %v2577_v3 = vpop.f32.mrf.mxu1  ;;  %v3059_v9 = vadd.f32 %v3058_v30, %v3057_v2  ;;  %v3062_v22 = vsel %vm3040_vm4, %v3019_v39, 0.0  ;;  %v2148_v31 = vadd.f32 %v5879_v60, %v5773_v19 }
 0x1df   : > { %v3060_v11 = vsel %vm3040_vm4, %v3018_v34, 0.0  ;;  %v2680_v42 = vadd.f32 %v2577_v3, %v2408_v48  ;;  %v4232_v54 = vpop.f32.mrf.mxu0  ;;  %v2988_v20 = vadd.f32 %v5920_v59, %v2949_v62  ;;  %v2952_v25 = vadd.f32 %v4229_v10, %v2681_v4 }
 0x1e0   : > { %v4182_v8 = vpop.f32.mrf.mxu1  ;;  %v3061_v49 = vadd.f32 %v3060_v11, %v3059_v9  ;;  %v3021_v35 = vmax.f32 %v2989_v7, 0.0 }
 0x1e1   : > { %v2951_v50 = vadd.f32 %v2848_v13, %v2680_v42  ;;  %v2683_v63 = vadd.f32 %v4182_v8, %v5860_v56  ;;  %v2858_v26 = vpop.f32.mrf.mxu0  ;;  %v3020_v29 = vmax.f32 %v2988_v20, 0.0  ;;  %v2991_v52 = vadd.f32 %v5920_v59, %v2952_v25  ;;  %v6311_v42 = vld [vmem:[#allocation41_spill] sm:$0xff]  ;;  %v6312_v25 = vld [vmem:[#allocation46_spill] sm:$0xff] }
 0x1e2   : > { %v2587_v46 = vpop.f32.mrf.mxu1  ;;  %v3063_v12 = vadd.f32 %v3062_v22, %v3061_v49  ;;  %v3066_v24 = vsel %vm3040_vm4, %v3021_v35, 0.0  ;;  %v2150_v19 = vadd.f32 %v5886_v15, %v6311_v42  ;;  %v6313_v49 = vld [vmem:[#allocation45_spill] sm:$0xff] }
 0x1e3   : > { %v2990_v45 = vadd.f32 %v5920_v59, %v2951_v50  ;;  %v2954_v18 = vadd.f32 %v4232_v54, %v2683_v63  ;;  %v2682_v27 = vadd.f32 %v2587_v46, %v2410_v36  ;;  %v4235_v43 = vpop.f32.mrf.mxu0  ;;  %v3064_v1 = vsel %vm3040_vm4, %v3020_v29, 0.0  ;;  %v6320_v42 = vld [vmem:[#allocation29_spill] sm:$0xff] }
 0x1e4   : > { %v4185_v56 = vpop.f32.mrf.mxu1  ;;  %v3065_v0 = vadd.f32 %v3064_v1, %v3063_v12  ;;  %v3023_v32 = vmax.f32 %v2991_v52, 0.0  ;;  %v2416_v50 = vadd.f32 %v6313_v49, %v2148_v31  ;;  %v6314_v12 = vld [vmem:[#allocation47_spill] sm:$0xff]  ;;  %v2152_v1 = vadd.f32 %v5893_v37, %v6315_v21 }
 0x1e5   : > { %v3022_v33 = vmax.f32 %v2990_v45, 0.0  ;;  %v2953_v6 = vadd.f32 %v2858_v26, %v2682_v27  ;;  %v2868_v14 = vpop.f32.mrf.mxu0  ;;  %v2993_v17 = vadd.f32 %v5920_v59, %v2954_v18  ;;  %v2685_v23 = vadd.f32 %v4185_v56, %v5867_v41 }
 0x1e6   : > { %v2597_v28 = vpop.f32.mrf.mxu1  ;;  %v3067_v58 = vadd.f32 %v3066_v24, %v3065_v0  ;;  %v3070_v34 = vsel %vm3040_vm4, %v3023_v32, 0.0  ;;  %v2418_v45 = vadd.f32 %v6314_v12, %v2150_v19  ;;  %v6316_v32 = vld [vmem:[#allocation19_spill] sm:$0xff] }
 0x1e7   : > { %v3068_v5 = vsel %vm3040_vm4, %v3022_v33, 0.0  ;;  %v2992_v40 = vadd.f32 %v5920_v59, %v2953_v6  ;;  %v4238_v16 = vpop.f32.mrf.mxu0  ;;  %v2956_v10 = vadd.f32 %v4235_v43, %v2685_v23  ;;  %v2684_v44 = vadd.f32 %v2597_v28, %v2412_v61 }
 0x1e8   : > { %v4188_v51 = vpop.f32.mrf.mxu1  ;;  %v3069_v48 = vadd.f32 %v3068_v5, %v3067_v58  ;;  %v3025_v13 = vmax.f32 %v2993_v17, 0.0 }
 0x1e9   : > { %v3024_v30 = vmax.f32 %v2992_v40, 0.0  ;;  %v2687_v2 = vadd.f32 %v4188_v51, %v5874_v47  ;;  %v2878_v41 = vpop.f32.mrf.mxu0  ;;  %v2995_v39 = vadd.f32 %v5920_v59, %v2956_v10  ;;  %v2955_v7 = vadd.f32 %v2868_v14, %v2684_v44  ;;  %v6318_v51 = vld [vmem:[#allocation24_spill] sm:$0xff] }
 0x1ea   : > { %v2607_v62 = vpop.f32.mrf.mxu1  ;;  %v3071_v4 = vadd.f32 %v3070_v34, %v3069_v48  ;;  %v3074_v63 = vsel %vm3040_vm4, %v3025_v13, 0.0  ;;  %v2420_v31 = vadd.f32 %v6318_v51, %v2152_v1 }
 0x1eb   : > { %v3072_v38 = vsel %vm3040_vm4, %v3024_v30, 0.0  ;;  %v2958_v3 = vadd.f32 %v4238_v16, %v2687_v2  ;;  %v2686_v9 = vadd.f32 %v2607_v62, %v2414_v53  ;;  %v4241_v11 = vpop.f32.mrf.mxu0  ;;  %v2994_v60 = vadd.f32 %v5920_v59, %v2955_v7  ;;  %v6317_v16 = vld [vmem:[#allocation43_spill] sm:$0xff] }
 0x1ec   : > { %v4191_v47 = vpop.f32.mrf.mxu1  ;;  %v3073_v54 = vadd.f32 %v3072_v38, %v3071_v4  ;;  %v3027_v36 = vmax.f32 %v2995_v39, 0.0  ;;  %v2154_v37 = vadd.f32 %v5900_v55, %v6317_v16  ;;  %v6319_v2 = vld [vmem:[#allocation27_spill] sm:$0xff] }
 0x1ed   : > { %v2957_v20 = vadd.f32 %v2878_v41, %v2686_v9  ;;  %v2689_v8 = vadd.f32 %v4191_v47, %v6312_v25  ;;  %v2888_v57 = vpop.f32.mrf.mxu0  ;;  %v3026_v26 = vmax.f32 %v2994_v60, 0.0  ;;  %v2997_v22 = vadd.f32 %v5920_v59, %v2958_v3 }
 0x1ee   : > { %v2617_v35 = vpop.f32.mrf.mxu1  ;;  %v3075_v29 = vadd.f32 %v3074_v63, %v3073_v54  ;;  %v3078_v56 = vsel %vm3040_vm4, %v3027_v36, 0.0  ;;  %v2422_v19 = vadd.f32 %v6320_v42, %v2154_v37  ;;  %v6321_v54 = vld [vmem:[#allocation44_spill] sm:$0xff]  ;;  %v6322_v36 = vld [vmem:[#allocation35_spill] sm:$0xff] }
 0x1ef   : > { %v2996_v15 = vadd.f32 %v5920_v59, %v2957_v20  ;;  %v2960_v52 = vadd.f32 %v4241_v11, %v2689_v8  ;;  %v4244_v46 = vpop.f32.mrf.mxu0  ;;  %v3076_v18 = vsel %vm3040_vm4, %v3026_v26, 0.0  ;;  %v2688_v27 = vadd.f32 %v2617_v35, %v2416_v50 }
 0x1f0   : > { %v4194_v43 = vpop.f32.mrf.mxu1  ;;  %v3077_v61 = vadd.f32 %v3076_v18, %v3075_v29  ;;  %v3029_v6 = vmax.f32 %v2997_v22, 0.0  ;;  %v2156_v20 = vadd.f32 %v6322_v36, %v6321_v54  ;;  %v6323_v22 = vld [vmem:[#allocation31_spill] sm:$0xff] }
 0x1f1   : > { %v3028_v0 = vmax.f32 %v2996_v15, 0.0  ;;  %v2898_v33 = vpop.f32.mrf.mxu0  ;;  %v2999_v14 = vadd.f32 %v5920_v59, %v2960_v52  ;;  %v2959_v24 = vadd.f32 %v2888_v57, %v2688_v27  ;;  %v2691_v17 = vadd.f32 %v4194_v43, %v6316_v32  ;;  %v6324_v43 = vld [vmem:[#allocation33_spill] sm:$0xff] }
 0x1f2   : > { %v2627_v23 = vpop.f32.mrf.mxu1  ;;  %v3079_v28 = vadd.f32 %v3078_v56, %v3077_v61  ;;  %v3082_v13 = vsel %vm3040_vm4, %v3029_v6, 0.0  ;;  %v2424_v21 = vadd.f32 %v6324_v43, %v2156_v20  ;;  %v6325_v61 = vld [vmem:[#allocation5_spill] sm:$0xff] }
 0x1f3   : > { %v3080_v58 = vsel %vm3040_vm4, %v3028_v0, 0.0  ;;  %v2690_v5 = vadd.f32 %v2627_v23, %v2418_v45  ;;  %v4247_v40 = vpop.f32.mrf.mxu0  ;;  %v2998_v53 = vadd.f32 %v5920_v59, %v2959_v24  ;;  %v2962_v10 = vadd.f32 %v4244_v46, %v2691_v17 }
 0x1f4   : > { %v4197_v44 = vpop.f32.mrf.mxu1  ;;  %v3081_v48 = vadd.f32 %v3080_v58, %v3079_v28  ;;  %v3031_v39 = vmax.f32 %v2999_v14, 0.0 }
 0x1f5   : > { %v2961_v30 = vadd.f32 %v2898_v33, %v2690_v5  ;;  %v2693_v41 = vadd.f32 %v4197_v44, %v6319_v2  ;;  %v2908_v34 = vpop.f32.mrf.mxu0  ;;  %v3030_v7 = vmax.f32 %v2998_v53, 0.0  ;;  %v3001_v62 = vadd.f32 %v5920_v59, %v2962_v10 }
 0x1f6   : > { %v2637_v4 = vpop.f32.mrf.mxu1  ;;  %v3083_v38 = vadd.f32 %v3082_v13, %v3081_v48  ;;  %v3086_v50 = vsel %vm3040_vm4, %v3031_v39, 0.0 }
 0x1f7   : > { %v3000_v55 = vadd.f32 %v5920_v59, %v2961_v30  ;;  %v2964_v3 = vadd.f32 %v4247_v40, %v2693_v41  ;;  %v2692_v9 = vadd.f32 %v2637_v4, %v2420_v31  ;;  %v4250_v11 = vpop.f32.mrf.mxu0  ;;  %v3084_v60 = vsel %vm3040_vm4, %v3030_v7, 0.0 }
 0x1f8   : > { %v4200_v47 = vpop.f32.mrf.mxu1  ;;  %v3085_v25 = vadd.f32 %v3084_v60, %v3083_v38  ;;  %v3033_v63 = vmax.f32 %v3001_v62, 0.0 }
 0x1f9   : > { %v3032_v8 = vmax.f32 %v3000_v55, 0.0  ;;  %v2963_v57 = vadd.f32 %v2908_v34, %v2692_v9  ;;  %v2918_v49 = vpop.f32.mrf.mxu0  ;;  %v3003_v26 = vadd.f32 %v5920_v59, %v2964_v3  ;;  %v2695_v35 = vadd.f32 %v4200_v47, %v6323_v22 }
 0x1fa   : > { %v2647_v29 = vpop.f32.mrf.mxu1  ;;  %v3087_v15 = vadd.f32 %v3086_v50, %v3085_v25  ;;  %v3090_v33 = vsel %vm3040_vm4, %v3033_v63, 0.0 }
 0x1fb   : > { %v3088_v52 = vsel %vm3040_vm4, %v3032_v8, 0.0  ;;  %v3002_v46 = vadd.f32 %v5920_v59, %v2963_v57  ;;  %v2966_v12 = vadd.f32 %v4250_v11, %v2695_v35  ;;  %v2694_v45 = vadd.f32 %v2647_v29, %v2422_v19  ;;  %v4253_v27 = vpop.f32.mrf.mxu0 }
 0x1fc   : > { %v4203_v18 = vpop.f32.mrf.mxu1  ;;  %v3089_v1 = vadd.f32 %v3088_v52, %v3087_v15  ;;  %v3035_v6 = vmax.f32 %v3003_v26, 0.0 }
 0x1fd   : > { %v3034_v56 = vmax.f32 %v3002_v46, 0.0  ;;  %v2697_v0 = vadd.f32 %v4203_v18, %v6325_v61  ;;  %v3005_v14 = vadd.f32 %v5920_v59, %v2966_v12  ;;  %v2965_v24 = vadd.f32 %v2918_v49, %v2694_v45  ;;  %v2928_v40 = vpop.f32.mrf.mxu0 }
 0x1fe   : > { %v2657_v32 = vpop.f32.mrf.mxu1  ;;  %v3091_v17 = vadd.f32 %v3090_v33, %v3089_v1  ;;  %v3094_v53 = vsel %vm3040_vm4, %v3035_v6, 0.0 }
 0x1ff   : > { %v3092_v23 = vsel %vm3040_vm4, %v3034_v56, 0.0  ;;  %v2968_v28 = vadd.f32 %v4253_v27, %v2697_v0  ;;  %v2696_v58 = vadd.f32 %v2657_v32, %v2424_v21  ;;  %v3004_v5 = vadd.f32 %v5920_v59, %v2965_v24 }
 0x200   : > { %v3093_v16 = vadd.f32 %v3092_v23, %v3091_v17  ;;  %v3037_v10 = vmax.f32 %v3005_v14, 0.0 }
 0x201   : > { %v2967_v37 = vadd.f32 %v2928_v40, %v2696_v58  ;;  %v3036_v44 = vmax.f32 %v3004_v5, 0.0  ;;  %v3007_v51 = vadd.f32 %v5920_v59, %v2968_v28 }
 0x202   : > { %v3095_v31 = vadd.f32 %v3094_v53, %v3093_v16  ;;  %v3098_v34 = vsel %vm3040_vm4, %v3037_v10, 0.0 }
 0x203   : > { %v3006_v48 = vadd.f32 %v5920_v59, %v2967_v37  ;;  %v3096_v30 = vsel %vm3040_vm4, %v3036_v44, 0.0  ;;  %v3039_v13 = vmax.f32 %v3007_v51, 0.0 }
 0x204   : > { %v3097_v2 = vadd.f32 %v3096_v30, %v3095_v31 }
 0x205   : > { %v3038_v41 = vmax.f32 %v3006_v48, 0.0  ;;  %v3102_v4 = vsel %vm3040_vm4, %v3039_v13, 0.0 }
 0x206   : > { %v3099_v39 = vadd.f32 %v3098_v34, %v3097_v2 }
 0x207   : > { %v3100_v7 = vsel %vm3040_vm4, %v3038_v41, 0.0 }
 0x208   : > { %v3101_v62 = vadd.f32 %v3100_v7, %v3099_v39 }
 0x20a   : > { %v3103_v38 = vadd.f32 %v3102_v4, %v3101_v62 }
 0x20c   : > { %v3104_v55 = vrot.slane %v3103_v38, 4 }
 0x20e   : > { %v3105_v3 = vadd.f32 %v3104_v55, %v3103_v38 }
 0x210   : > { %v3106_v9 = vrot.slane %v3105_v3, 2 }
 0x212   : > { %v3107_v11 = vadd.f32 %v3106_v9, %v3105_v3 }
 0x214   : > { %v3108_v59 = vrot.slane %v3107_v11, 1 }
 0x216   : > { %v3109_v42 = vadd.f32 %v3108_v59, %v3107_v11 }
 0x218   : > { %v3111_v19 = vmul.f32 0.00390625, %v3109_v42 }
 0x21a   : > { %v3112_v60 = vsel %vm3040_vm4, %v3111_v19, -inf }
 0x21b   : > { %3113 = vmax.xlane.f32.xlu0 %v3112_v60 }
 0x2a4   : > { %v3114_v47 = vpop.xlane.xlu0 %3113 }
 0x2a5   : > { %v3115_v54 = vsub.f32 %v3111_v19, %v3114_v47 }
 0x2a7   : > { %v3116_v36 = vmul.f32 1.442695, %v3115_v54 }
 0x2a9   : > { %4296 = vpow2.f32 %v3116_v36 }
 0x2b6   : > { %v4297_v20 = vpop.eup %4296 }
 0x2b7   : > { %v3118_v25 = vsel %vm3040_vm4, %v4297_v20, 0.0 }
 0x2b8   : > { %3119 = vadd.xlane.f32.xlu0 %v3118_v25 }
 0x341   : > { %v3120_v8 = vpop.xlane.xlu0 %3119 }
 0x342   : > { %4298 = vrcp.f32 %v3120_v8 }
 0x34f   : > { %v4299_v57 = vpop.eup %4298 }
 0x350   : > { %v3122_v49 = vmul.f32 %v4299_v57, %v4297_v20 }
 0x352   : > { %3124 = vst.msk [vmem:[%s162_s6] sm:$0x1] %vm3123_vm5, %v3122_v49 }
 0x353   : > { %4313 = shalt.err (!%p4310_p3)
}
 0x354   : > { %s4314_s24 = scalar_lea.hbm %s3136_s10, 16  ;;  %s4318_s27 = scalar_lea.hbm %s6083_s3, 32 }
 0x355   : > { %p4315_p4 = scmp.ne.s32.totalorder %s3136_s10, %s4314_s24  ;;  %p4319_p9 = scmp.lt.s32.totalorder %s3136_s10, %s6083_s3 }
 0x356   : > { %p4320_p10 = scmp.lt.s32.totalorder %s4318_s27, %s4314_s24 }
 0x357   : > { %p4316_p7 = pnand %p4315_p4, %p4421_p5 }
 0x358   : > { %p4321_p11 = por %p4320_p10, %p4319_p9 }
 0x359   : > { %p4317_p8 = pneg %p4316_p7 }
 0x35b   : > { %p4322_p12 = pnand %p4321_p11, %p4317_p8 }
 0x35d   : > { %4325 = shalt.err (!%p4322_p12)
}
 0x35e   : > { %4257 = dma.vmem_to_hbm [thread:$0]  (%p4421_p5), %s3139_s7, 16, %s3136_s10, %s3126_s11  }
 0x35f PF: > { %p4263_p13 = scmp.ge.s32.totalorder %s4360_s15, 2  ;;  %s3150_s30 = sand.u32 1, %s4348_s12  }
 0x360   : > { %s3151_s4 = scalar_lea.sflag [#allocation3], %s3150_s30 }
 0x361   : > { %p4260_p0 = pnand %p4263_p13, %p4425_p6 }
 0x363   : > { %p4261_p1 = pneg %p4260_p0 }
 0x365   : > { %4343 = dma.done.wait (%p4261_p1), %s3151_s4, 16  }
 0x366   : > { %4345 = vsyncadd (%p4261_p1), %s3151_s4, 4294967280  ;;  %p13_p2 = scmp.ge.s32.totalorder %s4408_s18, 4   ;;  %s6326_s12 = smov %s4352_s13 }
 0x367   : > { %s6327_s13 = smov %s4356_s14  ;;  %s6328_s14 = smov %s4419_s21 }
 0x368   : > { %s6329_s15 = smov %s4408_s18  ;;  %15 = sbr.rel (!%p13_p2) target bundleno = 3 (0x3), region = 75 }
 0x36d   :  { %3155 = vsyncpa [#allocation3], 1 }
 0x36e   :  { %3157 = vsyncpa [#allocation3 + $0x1], 1 }

</bundles_post_ra>
